<compile_context>
chip_gen: v7x
topology: tpu7x:2x2x1
jax: 0.10.0
libtpu: 0.0.40
codegen_flags: <defaults>
</compile_context>

<pallas_src>
from functools import partial

import numpy as np
import jax
import jax.numpy as jnp
from jax.experimental import pallas as pl
from jax.experimental.pallas import tpu as pltpu


def _round_up(x, m):
    return (x + m - 1) // m * m


def _centered_idft_matrix(n: int) -> np.ndarray:
    """M such that M @ x == fftshift(ifft(ifftshift(x), norm='ortho')) along axis 0."""
    eye = np.eye(n, dtype=np.complex128)
    m = np.fft.ifftshift(eye, axes=0)
    m = np.fft.ifft(m, axis=0, norm="ortho")
    m = np.fft.fftshift(m, axes=0)
    return m


# ----------------------------------------------------------------------------
# Kernel: one grid step = one (batch b, coil c) pair.
#   K      <- kspace[b, c] (* mask[b])                        (VPU, f32)
#   T      <- K @ M_W^T     Karatsuba complex matmul          (MXU, bf16/f32)
#   IMG    <- M_H @ T       Karatsuba complex matmul          (MXU, bf16/f32)
#   out[b] += IMG * conj(sens[b, c])                          (VPU, f32 accum)
# ----------------------------------------------------------------------------
def _backward_kernel(masked, *refs):
    if masked:
        (kr_ref, ki_ref, m_ref, sr_ref, si_ref,
         fhr_ref, fhi_ref, fhs_ref, fwr_ref, fwi_ref, fws_ref,
         out_r_ref, out_i_ref) = refs
    else:
        (kr_ref, ki_ref, sr_ref, si_ref,
         fhr_ref, fhi_ref, fhs_ref, fwr_ref, fwi_ref, fws_ref,
         out_r_ref, out_i_ref) = refs
        m_ref = None

    c = pl.program_id(1)

    @pl.when(c == 0)
    def _init():
        out_r_ref[...] = jnp.zeros_like(out_r_ref)
        out_i_ref[...] = jnp.zeros_like(out_i_ref)

    kr = kr_ref[...]                      # (Hp, Wp)  real k-space, this coil
    ki = ki_ref[...]                      # (Hp, Wp)  imag k-space
    if masked:
        m = m_ref[...]                    # (Hp, Wp)  broadcast mask
        kr = kr * m
        ki = ki * m

    mm_dtype = fwr_ref.dtype              # bf16 (default) or f32 MXU operands

    # ---- W-axis centered ortho IDFT:  T = K @ M_W^T  (3 real matmuls) ----
    p1 = jnp.dot(kr.astype(mm_dtype), fwr_ref[...],
                 preferred_element_type=jnp.float32)
    p2 = jnp.dot(ki.astype(mm_dtype), fwi_ref[...],
                 preferred_element_type=jnp.float32)
    p3 = jnp.dot((kr + ki).astype(mm_dtype), fws_ref[...],
                 preferred_element_type=jnp.float32)
    tr = p1 - p2
    ti = p3 - p1 - p2

    # ---- H-axis centered ortho IDFT:  IMG = M_H @ T ----
    q1 = jnp.dot(fhr_ref[...], tr.astype(mm_dtype),
                 preferred_element_type=jnp.float32)
    q2 = jnp.dot(fhi_ref[...], ti.astype(mm_dtype),
                 preferred_element_type=jnp.float32)
    q3 = jnp.dot(fhs_ref[...], (tr + ti).astype(mm_dtype),
                 preferred_element_type=jnp.float32)
    ir = q1 - q2
    ii = q3 - q1 - q2

    # ---- IMG * conj(sens), accumulated over coils in the resident output ----
    sr = sr_ref[...]
    si = si_ref[...]
    out_r_ref[...] += ir * sr + ii * si
    out_i_ref[...] += ii * sr - ir * si


def backward_operator(kspace, mask, sens_maps, buffer_size, masked=False,
                      precision="bf16", return_planar=False):
    """
    kspace:    [B, 1, C, H, W, 2*buffer_size]  float32
    mask:      [B, 1, 1, H, W, 1]              float32
    sens_maps: [B, 1, C, H, W, 2]              float32
    returns:   [B, 1, 1, H, W, 2]  float32   (or planar ((B,H,W),(B,H,W)) pair)
    """
    B, _, C, H, W, _ = kspace.shape
    Hp = _round_up(H, 8)        # sublane alignment
    Wp = _round_up(W, 128)      # lane-dense stores / full MXU tiles

    # Planar real/imag coil planes (cheap slices of contiguous planes).
    kr = kspace[:, 0, :, :, :, 0]
    ki = kspace[:, 0, :, :, :, buffer_size]
    sr = sens_maps[:, 0, :, :, :, 0]
    si = sens_maps[:, 0, :, :, :, 1]
    if (Hp, Wp) != (H, W):
        pad4 = ((0, 0), (0, 0), (0, Hp - H), (0, Wp - W))
        kr, ki = jnp.pad(kr, pad4), jnp.pad(ki, pad4)
        sr, si = jnp.pad(sr, pad4), jnp.pad(si, pad4)

    # Constant centered-IDFT matrices (shifts + ortho norm folded in), zero
    # padded; Karatsuba sums precomputed here instead of per grid step.
    mm_dtype = jnp.bfloat16 if precision == "bf16" else jnp.float32
    cbytes = 2 if precision == "bf16" else 4
    mh = np.zeros((Hp, Hp), np.complex128)
    mh[:H, :H] = _centered_idft_matrix(H)            # left multiply:  M_H @ T
    mwt = np.zeros((Wp, Wp), np.complex128)
    mwt[:W, :W] = _centered_idft_matrix(W).T         # right multiply: K @ M_W^T

    def _const(a):
        return jnp.asarray(np.asarray(a, np.float32), mm_dtype)

    fhr, fhi, fhs = _const(mh.real), _const(mh.imag), _const(mh.real + mh.imag)
    fwr, fwi, fws = _const(mwt.real), _const(mwt.imag), _const(mwt.real + mwt.imag)

    args = [kr, ki]
    if masked:
        m2d = mask[:, 0, 0, :, :, 0].astype(jnp.float32)
        if (Hp, Wp) != (H, W):
            m2d = jnp.pad(m2d, ((0, 0), (0, Hp - H), (0, Wp - W)))
        args.append(m2d)
    args += [sr, si, fhr, fhi, fhs, fwr, fwi, fws]

    coil_spec = pl.BlockSpec((None, None, Hp, Wp), lambda b, c: (b, c, 0, 0))
    plane_spec = pl.BlockSpec((None, Hp, Wp), lambda b, c: (b, 0, 0))

    # Advisory cost estimate (6 real matmuls per (batch, coil) step).
    flops = int(6 * 2 * B * C * Hp * Wp * (Hp + Wp))
    bytes_accessed = int(4 * (4 * B * C * Hp * Wp + 2 * B * Hp * Wp
                              + (B * Hp * Wp if masked else 0))
                         + cbytes * 3 * (Hp * Hp + Wp * Wp))
    cost = pl.CostEstimate(flops=flops, transcendentals=0,
                           bytes_accessed=bytes_accessed)

    # Explicit VMEM limit (per-generation defaults differ: 16 MiB on v5e,
    # 32 MiB on v6e/v7x), clamped to the chip's physical capacity (64 MiB/TC
    # on v7x) minus headroom for compiler scratch.
    need = (4 * 2 * (4 * Hp * Wp + (Hp * Wp if masked else 0) + 2 * Hp * Wp)
            + 2 * cbytes * 3 * (Hp * Hp + Wp * Wp)        # constants (worst case)
            + 4 * 14 * Hp * Wp)                           # loose live-temp bound
    try:
        cap = int(pltpu.get_tpu_info().vmem_capacity_bytes)
    except Exception:
        cap = 64 << 20
    vmem_limit = int(min(max(need * 3 // 2, 32 << 20), cap - (8 << 20)))

    def build(buffered_consts):
        if buffered_consts:
            cspec = lambda n: pl.BlockSpec((n, n), lambda b, c: (0, 0),
                                           pipeline_mode=pl.Buffered(1))
        else:
            cspec = lambda n: pl.BlockSpec((n, n), lambda b, c: (0, 0))
        in_specs = [coil_spec, coil_spec]
        if masked:
            in_specs.append(plane_spec)
        in_specs += [coil_spec, coil_spec,
                     cspec(Hp), cspec(Hp), cspec(Hp),
                     cspec(Wp), cspec(Wp), cspec(Wp)]
        return pl.pallas_call(
            partial(_backward_kernel, masked),
            out_shape=(jax.ShapeDtypeStruct((B, Hp, Wp), jnp.float32),
                       jax.ShapeDtypeStruct((B, Hp, Wp), jnp.float32)),
            grid_spec=pltpu.PrefetchScalarGridSpec(
                num_scalar_prefetch=0,
                grid=(B, C),
                in_specs=in_specs,
                out_specs=[plane_spec, plane_spec]),
            compiler_params=pltpu.CompilerParams(
                dimension_semantics=("parallel", "arbitrary"),
                vmem_limit_bytes=vmem_limit),
            cost_estimate=cost,
        )

    try:
        out_r, out_i = build(True)(*args)
    except Exception:
        # pipeline_mode=pl.Buffered(1) unsupported on this jax version:
        # fall back to default (double-buffered) constant specs.
        out_r, out_i = build(False)(*args)

    if (Hp, Wp) != (H, W):
        out_r = out_r[:, :H, :W]
        out_i = out_i[:, :H, :W]
    if return_planar:
        return out_r, out_i   # downstream kernels can consume planar planes

    # Module semantics need the trailing real/imag channel; keep this
    # lane-hostile re-layout at the model boundary only.
    out = jnp.stack([out_r, out_i], axis=-1)          # (B, H, W, 2)
    return out[:, None, None, :, :, :]                # (B, 1, 1, H, W, 2)


# ----------------------------------------------------------------------------
# Pure-JAX reference (mirrors the PyTorch forward exactly)
# ----------------------------------------------------------------------------
def backward_operator_ref(kspace, mask, sens_maps, buffer_size, masked=False):
    k = jnp.stack([kspace[..., 0], kspace[..., buffer_size]], axis=-1)
    if masked:
        k = k * mask + 0.0
    kc = k[..., 0] + 1j * k[..., 1]
    kc = jnp.fft.ifftshift(kc, axes=(-2, -1))
    im = jnp.fft.ifftn(kc, axes=(-2, -1), norm="ortho")
    im = jnp.fft.fftshift(im, axes=(-2, -1))
    sc = sens_maps[..., 0] + 1j * sens_maps[..., 1]
    res = jnp.sum(im * jnp.conj(sc), axis=2, keepdims=True)
    return jnp.stack([res.real, res.imag], axis=-1)


if __name__ == "__main__":
    B, C, H, W = 2, 4, 16, 16
    buffer_size = 3
    masked = True

    key = jax.random.PRNGKey(0)
    k1, k2, k3 = jax.random.split(key, 3)

    kspace = jax.random.normal(k1, (B, 1, C, H, W, 2 * buffer_size), dtype=jnp.float32)
    sens_maps = jax.random.normal(k2, (B, 1, C, H, W, 2), dtype=jnp.float32)
    mask = (jax.random.uniform(k3, (B, 1, 1, H, W, 1)) > 0.5).astype(jnp.float32)

    ref = jax.block_until_ready(
        backward_operator_ref(kspace, mask, sens_maps, buffer_size, masked=masked))

    # Exact path (f32 MXU operands): tight agreement with the reference.
    out_f32 = jax.block_until_ready(
        backward_operator(kspace, mask, sens_maps, buffer_size,
                          masked=masked, precision="float32"))
    assert out_f32.shape == (B, 1, 1, H, W, 2), out_f32.shape
    np.testing.assert_allclose(np.asarray(out_f32), np.asarray(ref),
                               rtol=1e-3, atol=1e-3)

    # Default fast path (bf16 MXU operands, f32 accumulation): bf16-level
    # (~1e-2) agreement expected.
    out_bf16 = jax.block_until_ready(
        backward_operator(kspace, mask, sens_maps, buffer_size, masked=masked))
    assert out_bf16.shape == (B, 1, 1, H, W, 2), out_bf16.shape
    np.testing.assert_allclose(np.asarray(out_bf16), np.asarray(ref),
                               rtol=1e-1, atol=1e-1)

    print("KERNEL_OK")
</pallas_src>

<mosaic_0001>
module attributes {stable_mosaic.version = 11 : i64} {
  func.func @_backward_kernel(%arg0: i32, %arg1: i32, %arg2: memref<1x1x16x128xf32, #tpu.memory_space<vmem>>, %arg3: memref<1x1x16x128xf32, #tpu.memory_space<vmem>>, %arg4: memref<1x16x128xf32, #tpu.memory_space<vmem>>, %arg5: memref<1x1x16x128xf32, #tpu.memory_space<vmem>>, %arg6: memref<1x1x16x128xf32, #tpu.memory_space<vmem>>, %arg7: memref<16x16xf32, #tpu.memory_space<vmem>>, %arg8: memref<16x16xf32, #tpu.memory_space<vmem>>, %arg9: memref<16x16xf32, #tpu.memory_space<vmem>>, %arg10: memref<128x128xf32, #tpu.memory_space<vmem>>, %arg11: memref<128x128xf32, #tpu.memory_space<vmem>>, %arg12: memref<128x128xf32, #tpu.memory_space<vmem>>, %arg13: memref<1x16x128xf32, #tpu.memory_space<vmem>>, %arg14: memref<1x16x128xf32, #tpu.memory_space<vmem>>) attributes {dimension_semantics = [#tpu.dimension_semantics<parallel>, #tpu.dimension_semantics<arbitrary>], iteration_bounds = array<i64: 2, 4>, scalar_prefetch = 0 : i64, scratch_operands = 0 : i64, tpu.core_type = #tpu.core_type<tc>, window_params = [{transform_indices = @transform_0, window_bounds = array<i64: 1, 1, 16, 128>}, {transform_indices = @transform_1, window_bounds = array<i64: 1, 1, 16, 128>}, {transform_indices = @transform_2, window_bounds = array<i64: 1, 16, 128>}, {transform_indices = @transform_3, window_bounds = array<i64: 1, 1, 16, 128>}, {transform_indices = @transform_4, window_bounds = array<i64: 1, 1, 16, 128>}, {pipeline_mode = #tpu.pipeline_mode<synchronous>, transform_indices = @transform_5, window_bounds = array<i64: 16, 16>}, {pipeline_mode = #tpu.pipeline_mode<synchronous>, transform_indices = @transform_6, window_bounds = array<i64: 16, 16>}, {pipeline_mode = #tpu.pipeline_mode<synchronous>, transform_indices = @transform_7, window_bounds = array<i64: 16, 16>}, {pipeline_mode = #tpu.pipeline_mode<synchronous>, transform_indices = @transform_8, window_bounds = array<i64: 128, 128>}, {pipeline_mode = #tpu.pipeline_mode<synchronous>, transform_indices = @transform_9, window_bounds = array<i64: 128, 128>}, {pipeline_mode = #tpu.pipeline_mode<synchronous>, transform_indices = @transform_10, window_bounds = array<i64: 128, 128>}, {transform_indices = @transform_11, window_bounds = array<i64: 1, 16, 128>}, {transform_indices = @transform_12, window_bounds = array<i64: 1, 16, 128>}]} {
    %c0_i32 = arith.constant 0 : i32
    %0 = arith.cmpi eq, %arg1, %c0_i32 : i32
    %1 = arith.extui %0 : i1 to i32
    %c0_i32_0 = arith.constant 0 : i32
    %2 = arith.cmpi ne, %1, %c0_i32_0 : i32
    scf.if %2 {
      %cst_48 = arith.constant 0.000000e+00 : f32
      %53 = vector.broadcast %cst_48 : f32 to vector<16x128xf32>
      %c0_49 = arith.constant 0 : index
      %c0_50 = arith.constant 0 : index
      %c0_51 = arith.constant 0 : index
      %54 = vector.load %arg13[%c0_49, %c0_50, %c0_51] : memref<1x16x128xf32, #tpu.memory_space<vmem>>, vector<1x16x128xf32>
      %55 = vector.shape_cast %54 : vector<1x16x128xf32> to vector<16x128xf32>
      %56 = vector.shape_cast %53 : vector<16x128xf32> to vector<1x16x128xf32>
      tpu.vector_store %arg13[%c0_49, %c0_50, %c0_51], %56 {strides = array<i32>} : memref<1x16x128xf32, #tpu.memory_space<vmem>>, vector<1x16x128xf32>,
      %cst_52 = arith.constant 0.000000e+00 : f32
      %57 = vector.broadcast %cst_52 : f32 to vector<16x128xf32>
      %c0_53 = arith.constant 0 : index
      %c0_54 = arith.constant 0 : index
      %c0_55 = arith.constant 0 : index
      %58 = vector.load %arg14[%c0_53, %c0_54, %c0_55] : memref<1x16x128xf32, #tpu.memory_space<vmem>>, vector<1x16x128xf32>
      %59 = vector.shape_cast %58 : vector<1x16x128xf32> to vector<16x128xf32>
      %60 = vector.shape_cast %57 : vector<16x128xf32> to vector<1x16x128xf32>
      tpu.vector_store %arg14[%c0_53, %c0_54, %c0_55], %60 {strides = array<i32>} : memref<1x16x128xf32, #tpu.memory_space<vmem>>, vector<1x16x128xf32>,
    } else {
    }
    %c0 = arith.constant 0 : index
    %c0_1 = arith.constant 0 : index
    %c0_2 = arith.constant 0 : index
    %c0_3 = arith.constant 0 : index
    %3 = vector.load %arg2[%c0, %c0_1, %c0_2, %c0_3] : memref<1x1x16x128xf32, #tpu.memory_space<vmem>>, vector<1x1x16x128xf32>
    %4 = vector.shape_cast %3 : vector<1x1x16x128xf32> to vector<16x128xf32>
    %c0_4 = arith.constant 0 : index
    %c0_5 = arith.constant 0 : index
    %c0_6 = arith.constant 0 : index
    %c0_7 = arith.constant 0 : index
    %5 = vector.load %arg3[%c0_4, %c0_5, %c0_6, %c0_7] : memref<1x1x16x128xf32, #tpu.memory_space<vmem>>, vector<1x1x16x128xf32>
    %6 = vector.shape_cast %5 : vector<1x1x16x128xf32> to vector<16x128xf32>
    %c0_8 = arith.constant 0 : index
    %c0_9 = arith.constant 0 : index
    %c0_10 = arith.constant 0 : index
    %7 = vector.load %arg4[%c0_8, %c0_9, %c0_10] : memref<1x16x128xf32, #tpu.memory_space<vmem>>, vector<1x16x128xf32>
    %8 = vector.shape_cast %7 : vector<1x16x128xf32> to vector<16x128xf32>
    %9 = arith.mulf %4, %8 : vector<16x128xf32>
    %10 = arith.mulf %6, %8 : vector<16x128xf32>
    %c0_11 = arith.constant 0 : index
    %c0_12 = arith.constant 0 : index
    %11 = vector.load %arg10[%c0_11, %c0_12] : memref<128x128xf32, #tpu.memory_space<vmem>>, vector<128x128xf32>
    %cst = arith.constant dense<0.000000e+00> : vector<16x128xf32>
    %12 = tpu.matmul %9, %11, %cst {dimension_numbers = #tpu.dot_dimension_numbers<[1], [0], [0], [1], [0, 0, 1, 1], [], []>} : vector<16x128xf32>, vector<128x128xf32>, vector<16x128xf32> -> vector<16x128xf32>
    %c0_13 = arith.constant 0 : index
    %c0_14 = arith.constant 0 : index
    %13 = vector.load %arg11[%c0_13, %c0_14] : memref<128x128xf32, #tpu.memory_space<vmem>>, vector<128x128xf32>
    %cst_15 = arith.constant dense<0.000000e+00> : vector<16x128xf32>
    %14 = tpu.matmul %10, %13, %cst_15 {dimension_numbers = #tpu.dot_dimension_numbers<[1], [0], [0], [1], [0, 0, 1, 1], [], []>} : vector<16x128xf32>, vector<128x128xf32>, vector<16x128xf32> -> vector<16x128xf32>
    %15 = arith.addf %9, %10 : vector<16x128xf32>
    %c0_16 = arith.constant 0 : index
    %c0_17 = arith.constant 0 : index
    %16 = vector.load %arg12[%c0_16, %c0_17] : memref<128x128xf32, #tpu.memory_space<vmem>>, vector<128x128xf32>
    %cst_18 = arith.constant dense<0.000000e+00> : vector<16x128xf32>
    %17 = tpu.matmul %15, %16, %cst_18 {dimension_numbers = #tpu.dot_dimension_numbers<[1], [0], [0], [1], [0, 0, 1, 1], [], []>} : vector<16x128xf32>, vector<128x128xf32>, vector<16x128xf32> -> vector<16x128xf32>
    %18 = arith.subf %12, %14 : vector<16x128xf32>
    %19 = arith.subf %17, %12 : vector<16x128xf32>
    %20 = arith.subf %19, %14 : vector<16x128xf32>
    %c0_19 = arith.constant 0 : index
    %c0_20 = arith.constant 0 : index
    %21 = vector.load %arg7[%c0_19, %c0_20] : memref<16x16xf32, #tpu.memory_space<vmem>>, vector<16x16xf32>
    %cst_21 = arith.constant dense<0.000000e+00> : vector<16x128xf32>
    %22 = tpu.matmul %21, %18, %cst_21 {dimension_numbers = #tpu.dot_dimension_numbers<[1], [0], [0], [1], [0, 0, 1, 1], [], []>} : vector<16x16xf32>, vector<16x128xf32>, vector<16x128xf32> -> vector<16x128xf32>
    %c0_22 = arith.constant 0 : index
    %c0_23 = arith.constant 0 : index
    %23 = vector.load %arg8[%c0_22, %c0_23] : memref<16x16xf32, #tpu.memory_space<vmem>>, vector<16x16xf32>
    %cst_24 = arith.constant dense<0.000000e+00> : vector<16x128xf32>
    %24 = tpu.matmul %23, %20, %cst_24 {dimension_numbers = #tpu.dot_dimension_numbers<[1], [0], [0], [1], [0, 0, 1, 1], [], []>} : vector<16x16xf32>, vector<16x128xf32>, vector<16x128xf32> -> vector<16x128xf32>
    %c0_25 = arith.constant 0 : index
    %c0_26 = arith.constant 0 : index
    %25 = vector.load %arg9[%c0_25, %c0_26] : memref<16x16xf32, #tpu.memory_space<vmem>>, vector<16x16xf32>
    %26 = arith.addf %18, %20 : vector<16x128xf32>
    %cst_27 = arith.constant dense<0.000000e+00> : vector<16x128xf32>
    %27 = tpu.matmul %25, %26, %cst_27 {dimension_numbers = #tpu.dot_dimension_numbers<[1], [0], [0], [1], [0, 0, 1, 1], [], []>} : vector<16x16xf32>, vector<16x128xf32>, vector<16x128xf32> -> vector<16x128xf32>
    %28 = arith.subf %22, %24 : vector<16x128xf32>
    %29 = arith.subf %27, %22 : vector<16x128xf32>
    %30 = arith.subf %29, %24 : vector<16x128xf32>
    %c0_28 = arith.constant 0 : index
    %c0_29 = arith.constant 0 : index
    %c0_30 = arith.constant 0 : index
    %c0_31 = arith.constant 0 : index
    %31 = vector.load %arg5[%c0_28, %c0_29, %c0_30, %c0_31] : memref<1x1x16x128xf32, #tpu.memory_space<vmem>>, vector<1x1x16x128xf32>
    %32 = vector.shape_cast %31 : vector<1x1x16x128xf32> to vector<16x128xf32>
    %c0_32 = arith.constant 0 : index
    %c0_33 = arith.constant 0 : index
    %c0_34 = arith.constant 0 : index
    %c0_35 = arith.constant 0 : index
    %33 = vector.load %arg6[%c0_32, %c0_33, %c0_34, %c0_35] : memref<1x1x16x128xf32, #tpu.memory_space<vmem>>, vector<1x1x16x128xf32>
    %34 = vector.shape_cast %33 : vector<1x1x16x128xf32> to vector<16x128xf32>
    %c0_36 = arith.constant 0 : index
    %c0_37 = arith.constant 0 : index
    %c0_38 = arith.constant 0 : index
    %35 = vector.load %arg13[%c0_36, %c0_37, %c0_38] : memref<1x16x128xf32, #tpu.memory_space<vmem>>, vector<1x16x128xf32>
    %36 = vector.shape_cast %35 : vector<1x16x128xf32> to vector<16x128xf32>
    %37 = arith.mulf %28, %32 : vector<16x128xf32>
    %38 = arith.mulf %30, %34 : vector<16x128xf32>
    %39 = arith.addf %37, %38 : vector<16x128xf32>
    %40 = arith.addf %36, %39 : vector<16x128xf32>
    %c0_39 = arith.constant 0 : index
    %c0_40 = arith.constant 0 : index
    %c0_41 = arith.constant 0 : index
    %41 = vector.load %arg13[%c0_39, %c0_40, %c0_41] : memref<1x16x128xf32, #tpu.memory_space<vmem>>, vector<1x16x128xf32>
    %42 = vector.shape_cast %41 : vector<1x16x128xf32> to vector<16x128xf32>
    %43 = vector.shape_cast %40 : vector<16x128xf32> to vector<1x16x128xf32>
    tpu.vector_store %arg13[%c0_39, %c0_40, %c0_41], %43 {strides = array<i32>} : memref<1x16x128xf32, #tpu.memory_space<vmem>>, vector<1x16x128xf32>,
    %c0_42 = arith.constant 0 : index
    %c0_43 = arith.constant 0 : index
    %c0_44 = arith.constant 0 : index
    %44 = vector.load %arg14[%c0_42, %c0_43, %c0_44] : memref<1x16x128xf32, #tpu.memory_space<vmem>>, vector<1x16x128xf32>
    %45 = vector.shape_cast %44 : vector<1x16x128xf32> to vector<16x128xf32>
    %46 = arith.mulf %30, %32 : vector<16x128xf32>
    %47 = arith.mulf %28, %34 : vector<16x128xf32>
    %48 = arith.subf %46, %47 : vector<16x128xf32>
    %49 = arith.addf %45, %48 : vector<16x128xf32>
    %c0_45 = arith.constant 0 : index
    %c0_46 = arith.constant 0 : index
    %c0_47 = arith.constant 0 : index
    %50 = vector.load %arg14[%c0_45, %c0_46, %c0_47] : memref<1x16x128xf32, #tpu.memory_space<vmem>>, vector<1x16x128xf32>
    %51 = vector.shape_cast %50 : vector<1x16x128xf32> to vector<16x128xf32>
    %52 = vector.shape_cast %49 : vector<16x128xf32> to vector<1x16x128xf32>
    tpu.vector_store %arg14[%c0_45, %c0_46, %c0_47], %52 {strides = array<i32>} : memref<1x16x128xf32, #tpu.memory_space<vmem>>, vector<1x16x128xf32>,
    return
  }
  func.func @transform_0(%arg0: i32, %arg1: i32) -> (i32, i32, i32, i32) {
    %c0_i32 = arith.constant 0 : i32
    %c0_i32_0 = arith.constant 0 : i32
    %c0_i32_1 = arith.constant 0 : i32
    return %arg0, %arg1, %c0_i32, %c0_i32_0 : i32, i32, i32, i32
  }
  func.func @transform_1(%arg0: i32, %arg1: i32) -> (i32, i32, i32, i32) {
    %c0_i32 = arith.constant 0 : i32
    %c0_i32_0 = arith.constant 0 : i32
    %c0_i32_1 = arith.constant 0 : i32
    return %arg0, %arg1, %c0_i32, %c0_i32_0 : i32, i32, i32, i32
  }
  func.func @transform_2(%arg0: i32, %arg1: i32) -> (i32, i32, i32) {
    %c0_i32 = arith.constant 0 : i32
    %c0_i32_0 = arith.constant 0 : i32
    %c0_i32_1 = arith.constant 0 : i32
    return %arg0, %c0_i32, %c0_i32_0 : i32, i32, i32
  }
  func.func @transform_3(%arg0: i32, %arg1: i32) -> (i32, i32, i32, i32) {
    %c0_i32 = arith.constant 0 : i32
    %c0_i32_0 = arith.constant 0 : i32
    %c0_i32_1 = arith.constant 0 : i32
    return %arg0, %arg1, %c0_i32, %c0_i32_0 : i32, i32, i32, i32
  }
  func.func @transform_4(%arg0: i32, %arg1: i32) -> (i32, i32, i32, i32) {
    %c0_i32 = arith.constant 0 : i32
    %c0_i32_0 = arith.constant 0 : i32
    %c0_i32_1 = arith.constant 0 : i32
    return %arg0, %arg1, %c0_i32, %c0_i32_0 : i32, i32, i32, i32
  }
  func.func @transform_5(%arg0: i32, %arg1: i32) -> (i32, i32) {
    %c0_i32 = arith.constant 0 : i32
    %c0_i32_0 = arith.constant 0 : i32
    %c0_i32_1 = arith.constant 0 : i32
    return %c0_i32, %c0_i32_0 : i32, i32
  }
  func.func @transform_6(%arg0: i32, %arg1: i32) -> (i32, i32) {
    %c0_i32 = arith.constant 0 : i32
    %c0_i32_0 = arith.constant 0 : i32
    %c0_i32_1 = arith.constant 0 : i32
    return %c0_i32, %c0_i32_0 : i32, i32
  }
  func.func @transform_7(%arg0: i32, %arg1: i32) -> (i32, i32) {
    %c0_i32 = arith.constant 0 : i32
    %c0_i32_0 = arith.constant 0 : i32
    %c0_i32_1 = arith.constant 0 : i32
    return %c0_i32, %c0_i32_0 : i32, i32
  }
  func.func @transform_8(%arg0: i32, %arg1: i32) -> (i32, i32) {
    %c0_i32 = arith.constant 0 : i32
    %c0_i32_0 = arith.constant 0 : i32
    %c0_i32_1 = arith.constant 0 : i32
    return %c0_i32, %c0_i32_0 : i32, i32
  }
  func.func @transform_9(%arg0: i32, %arg1: i32) -> (i32, i32) {
    %c0_i32 = arith.constant 0 : i32
    %c0_i32_0 = arith.constant 0 : i32
    %c0_i32_1 = arith.constant 0 : i32
    return %c0_i32, %c0_i32_0 : i32, i32
  }
  func.func @transform_10(%arg0: i32, %arg1: i32) -> (i32, i32) {
    %c0_i32 = arith.constant 0 : i32
    %c0_i32_0 = arith.constant 0 : i32
    %c0_i32_1 = arith.constant 0 : i32
    return %c0_i32, %c0_i32_0 : i32, i32
  }
  func.func @transform_11(%arg0: i32, %arg1: i32) -> (i32, i32, i32) {
    %c0_i32 = arith.constant 0 : i32
    %c0_i32_0 = arith.constant 0 : i32
    %c0_i32_1 = arith.constant 0 : i32
    return %arg0, %c0_i32, %c0_i32_0 : i32, i32, i32
  }
  func.func @transform_12(%arg0: i32, %arg1: i32) -> (i32, i32, i32) {
    %c0_i32 = arith.constant 0 : i32
    %c0_i32_0 = arith.constant 0 : i32
    %c0_i32_1 = arith.constant 0 : i32
    return %arg0, %c0_i32, %c0_i32_0 : i32, i32, i32
  }
}

module attributes {stable_mosaic.version = 11 : i64} {
  func.func @_backward_kernel(%arg0: i32, %arg1: i32, %arg2: memref<1x1x16x128xf32, #tpu.memory_space<vmem>>, %arg3: memref<1x1x16x128xf32, #tpu.memory_space<vmem>>, %arg4: memref<1x16x128xf32, #tpu.memory_space<vmem>>, %arg5: memref<1x1x16x128xf32, #tpu.memory_space<vmem>>, %arg6: memref<1x1x16x128xf32, #tpu.memory_space<vmem>>, %arg7: memref<16x16xf32, #tpu.memory_space<vmem>>, %arg8: memref<16x16xf32, #tpu.memory_space<vmem>>, %arg9: memref<16x16xf32, #tpu.memory_space<vmem>>, %arg10: memref<128x128xf32, #tpu.memory_space<vmem>>, %arg11: memref<128x128xf32, #tpu.memory_space<vmem>>, %arg12: memref<128x128xf32, #tpu.memory_space<vmem>>, %arg13: memref<1x16x128xf32, #tpu.memory_space<vmem>>, %arg14: memref<1x16x128xf32, #tpu.memory_space<vmem>>) attributes {dimension_semantics = [#tpu.dimension_semantics<parallel>, #tpu.dimension_semantics<arbitrary>], iteration_bounds = array<i64: 2, 4>, scalar_prefetch = 0 : i64, scratch_operands = 0 : i64, tpu.core_type = #tpu.core_type<tc>, window_params = [{transform_indices = @transform_0, window_bounds = array<i64: 1, 1, 16, 128>}, {transform_indices = @transform_1, window_bounds = array<i64: 1, 1, 16, 128>}, {transform_indices = @transform_2, window_bounds = array<i64: 1, 16, 128>}, {transform_indices = @transform_3, window_bounds = array<i64: 1, 1, 16, 128>}, {transform_indices = @transform_4, window_bounds = array<i64: 1, 1, 16, 128>}, {pipeline_mode = #tpu.pipeline_mode<synchronous>, transform_indices = @transform_5, window_bounds = array<i64: 16, 16>}, {pipeline_mode = #tpu.pipeline_mode<synchronous>, transform_indices = @transform_6, window_bounds = array<i64: 16, 16>}, {pipeline_mode = #tpu.pipeline_mode<synchronous>, transform_indices = @transform_7, window_bounds = array<i64: 16, 16>}, {pipeline_mode = #tpu.pipeline_mode<synchronous>, transform_indices = @transform_8, window_bounds = array<i64: 128, 128>}, {pipeline_mode = #tpu.pipeline_mode<synchronous>, transform_indices = @transform_9, window_bounds = array<i64: 128, 128>}, {pipeline_mode = #tpu.pipeline_mode<synchronous>, transform_indices = @transform_10, window_bounds = array<i64: 128, 128>}, {transform_indices = @transform_11, window_bounds = array<i64: 1, 16, 128>}, {transform_indices = @transform_12, window_bounds = array<i64: 1, 16, 128>}]} {
    %c0_i32 = arith.constant 0 : i32
    %0 = arith.cmpi eq, %arg1, %c0_i32 : i32
    %1 = arith.extui %0 : i1 to i32
    %c0_i32_0 = arith.constant 0 : i32
    %2 = arith.cmpi ne, %1, %c0_i32_0 : i32
    scf.if %2 {
      %cst_48 = arith.constant 0.000000e+00 : f32
      %53 = vector.broadcast %cst_48 : f32 to vector<16x128xf32>
      %c0_49 = arith.constant 0 : index
      %c0_50 = arith.constant 0 : index
      %c0_51 = arith.constant 0 : index
      %54 = vector.load %arg13[%c0_49, %c0_50, %c0_51] : memref<1x16x128xf32, #tpu.memory_space<vmem>>, vector<1x16x128xf32>
      %55 = vector.shape_cast %54 : vector<1x16x128xf32> to vector<16x128xf32>
      %56 = vector.shape_cast %53 : vector<16x128xf32> to vector<1x16x128xf32>
      tpu.vector_store %arg13[%c0_49, %c0_50, %c0_51], %56 {strides = array<i32>} : memref<1x16x128xf32, #tpu.memory_space<vmem>>, vector<1x16x128xf32>,
      %cst_52 = arith.constant 0.000000e+00 : f32
      %57 = vector.broadcast %cst_52 : f32 to vector<16x128xf32>
      %c0_53 = arith.constant 0 : index
      %c0_54 = arith.constant 0 : index
      %c0_55 = arith.constant 0 : index
      %58 = vector.load %arg14[%c0_53, %c0_54, %c0_55] : memref<1x16x128xf32, #tpu.memory_space<vmem>>, vector<1x16x128xf32>
      %59 = vector.shape_cast %58 : vector<1x16x128xf32> to vector<16x128xf32>
      %60 = vector.shape_cast %57 : vector<16x128xf32> to vector<1x16x128xf32>
      tpu.vector_store %arg14[%c0_53, %c0_54, %c0_55], %60 {strides = array<i32>} : memref<1x16x128xf32, #tpu.memory_space<vmem>>, vector<1x16x128xf32>,
    } else {
    }
    %c0 = arith.constant 0 : index
    %c0_1 = arith.constant 0 : index
    %c0_2 = arith.constant 0 : index
    %c0_3 = arith.constant 0 : index
    %3 = vector.load %arg2[%c0, %c0_1, %c0_2, %c0_3] : memref<1x1x16x128xf32, #tpu.memory_space<vmem>>, vector<1x1x16x128xf32>
    %4 = vector.shape_cast %3 : vector<1x1x16x128xf32> to vector<16x128xf32>
    %c0_4 = arith.constant 0 : index
    %c0_5 = arith.constant 0 : index
    %c0_6 = arith.constant 0 : index
    %c0_7 = arith.constant 0 : index
    %5 = vector.load %arg3[%c0_4, %c0_5, %c0_6, %c0_7] : memref<1x1x16x128xf32, #tpu.memory_space<vmem>>, vector<1x1x16x128xf32>
    %6 = vector.shape_cast %5 : vector<1x1x16x128xf32> to vector<16x128xf32>
    %c0_8 = arith.constant 0 : index
    %c0_9 = arith.constant 0 : index
    %c0_10 = arith.constant 0 : index
    %7 = vector.load %arg4[%c0_8, %c0_9, %c0_10] : memref<1x16x128xf32, #tpu.memory_space<vmem>>, vector<1x16x128xf32>
    %8 = vector.shape_cast %7 : vector<1x16x128xf32> to vector<16x128xf32>
    %9 = arith.mulf %4, %8 : vector<16x128xf32>
    %10 = arith.mulf %6, %8 : vector<16x128xf32>
    %c0_11 = arith.constant 0 : index
    %c0_12 = arith.constant 0 : index
    %11 = vector.load %arg10[%c0_11, %c0_12] : memref<128x128xf32, #tpu.memory_space<vmem>>, vector<128x128xf32>
    %cst = arith.constant dense<0.000000e+00> : vector<16x128xf32>
    %12 = tpu.matmul %9, %11, %cst {dimension_numbers = #tpu.dot_dimension_numbers<[1], [0], [0], [1], [0, 0, 1, 1], [], []>} : vector<16x128xf32>, vector<128x128xf32>, vector<16x128xf32> -> vector<16x128xf32>
    %c0_13 = arith.constant 0 : index
    %c0_14 = arith.constant 0 : index
    %13 = vector.load %arg11[%c0_13, %c0_14] : memref<128x128xf32, #tpu.memory_space<vmem>>, vector<128x128xf32>
    %cst_15 = arith.constant dense<0.000000e+00> : vector<16x128xf32>
    %14 = tpu.matmul %10, %13, %cst_15 {dimension_numbers = #tpu.dot_dimension_numbers<[1], [0], [0], [1], [0, 0, 1, 1], [], []>} : vector<16x128xf32>, vector<128x128xf32>, vector<16x128xf32> -> vector<16x128xf32>
    %15 = arith.addf %9, %10 : vector<16x128xf32>
    %c0_16 = arith.constant 0 : index
    %c0_17 = arith.constant 0 : index
    %16 = vector.load %arg12[%c0_16, %c0_17] : memref<128x128xf32, #tpu.memory_space<vmem>>, vector<128x128xf32>
    %cst_18 = arith.constant dense<0.000000e+00> : vector<16x128xf32>
    %17 = tpu.matmul %15, %16, %cst_18 {dimension_numbers = #tpu.dot_dimension_numbers<[1], [0], [0], [1], [0, 0, 1, 1], [], []>} : vector<16x128xf32>, vector<128x128xf32>, vector<16x128xf32> -> vector<16x128xf32>
    %18 = arith.subf %12, %14 : vector<16x128xf32>
    %19 = arith.subf %17, %12 : vector<16x128xf32>
    %20 = arith.subf %19, %14 : vector<16x128xf32>
    %c0_19 = arith.constant 0 : index
    %c0_20 = arith.constant 0 : index
    %21 = vector.load %arg7[%c0_19, %c0_20] : memref<16x16xf32, #tpu.memory_space<vmem>>, vector<16x16xf32>
    %cst_21 = arith.constant dense<0.000000e+00> : vector<16x128xf32>
    %22 = tpu.matmul %21, %18, %cst_21 {dimension_numbers = #tpu.dot_dimension_numbers<[1], [0], [0], [1], [0, 0, 1, 1], [], []>} : vector<16x16xf32>, vector<16x128xf32>, vector<16x128xf32> -> vector<16x128xf32>
    %c0_22 = arith.constant 0 : index
    %c0_23 = arith.constant 0 : index
    %23 = vector.load %arg8[%c0_22, %c0_23] : memref<16x16xf32, #tpu.memory_space<vmem>>, vector<16x16xf32>
    %cst_24 = arith.constant dense<0.000000e+00> : vector<16x128xf32>
    %24 = tpu.matmul %23, %20, %cst_24 {dimension_numbers = #tpu.dot_dimension_numbers<[1], [0], [0], [1], [0, 0, 1, 1], [], []>} : vector<16x16xf32>, vector<16x128xf32>, vector<16x128xf32> -> vector<16x128xf32>
    %c0_25 = arith.constant 0 : index
    %c0_26 = arith.constant 0 : index
    %25 = vector.load %arg9[%c0_25, %c0_26] : memref<16x16xf32, #tpu.memory_space<vmem>>, vector<16x16xf32>
    %26 = arith.addf %18, %20 : vector<16x128xf32>
    %cst_27 = arith.constant dense<0.000000e+00> : vector<16x128xf32>
    %27 = tpu.matmul %25, %26, %cst_27 {dimension_numbers = #tpu.dot_dimension_numbers<[1], [0], [0], [1], [0, 0, 1, 1], [], []>} : vector<16x16xf32>, vector<16x128xf32>, vector<16x128xf32> -> vector<16x128xf32>
    %28 = arith.subf %22, %24 : vector<16x128xf32>
    %29 = arith.subf %27, %22 : vector<16x128xf32>
    %30 = arith.subf %29, %24 : vector<16x128xf32>
    %c0_28 = arith.constant 0 : index
    %c0_29 = arith.constant 0 : index
    %c0_30 = arith.constant 0 : index
    %c0_31 = arith.constant 0 : index
    %31 = vector.load %arg5[%c0_28, %c0_29, %c0_30, %c0_31] : memref<1x1x16x128xf32, #tpu.memory_space<vmem>>, vector<1x1x16x128xf32>
    %32 = vector.shape_cast %31 : vector<1x1x16x128xf32> to vector<16x128xf32>
    %c0_32 = arith.constant 0 : index
    %c0_33 = arith.constant 0 : index
    %c0_34 = arith.constant 0 : index
    %c0_35 = arith.constant 0 : index
    %33 = vector.load %arg6[%c0_32, %c0_33, %c0_34, %c0_35] : memref<1x1x16x128xf32, #tpu.memory_space<vmem>>, vector<1x1x16x128xf32>
    %34 = vector.shape_cast %33 : vector<1x1x16x128xf32> to vector<16x128xf32>
    %c0_36 = arith.constant 0 : index
    %c0_37 = arith.constant 0 : index
    %c0_38 = arith.constant 0 : index
    %35 = vector.load %arg13[%c0_36, %c0_37, %c0_38] : memref<1x16x128xf32, #tpu.memory_space<vmem>>, vector<1x16x128xf32>
    %36 = vector.shape_cast %35 : vector<1x16x128xf32> to vector<16x128xf32>
    %37 = arith.mulf %28, %32 : vector<16x128xf32>
    %38 = arith.mulf %30, %34 : vector<16x128xf32>
    %39 = arith.addf %37, %38 : vector<16x128xf32>
    %40 = arith.addf %36, %39 : vector<16x128xf32>
    %c0_39 = arith.constant 0 : index
    %c0_40 = arith.constant 0 : index
    %c0_41 = arith.constant 0 : index
    %41 = vector.load %arg13[%c0_39, %c0_40, %c0_41] : memref<1x16x128xf32, #tpu.memory_space<vmem>>, vector<1x16x128xf32>
    %42 = vector.shape_cast %41 : vector<1x16x128xf32> to vector<16x128xf32>
    %43 = vector.shape_cast %40 : vector<16x128xf32> to vector<1x16x128xf32>
    tpu.vector_store %arg13[%c0_39, %c0_40, %c0_41], %43 {strides = array<i32>} : memref<1x16x128xf32, #tpu.memory_space<vmem>>, vector<1x16x128xf32>,
    %c0_42 = arith.constant 0 : index
    %c0_43 = arith.constant 0 : index
    %c0_44 = arith.constant 0 : index
    %44 = vector.load %arg14[%c0_42, %c0_43, %c0_44] : memref<1x16x128xf32, #tpu.memory_space<vmem>>, vector<1x16x128xf32>
    %45 = vector.shape_cast %44 : vector<1x16x128xf32> to vector<16x128xf32>
    %46 = arith.mulf %30, %32 : vector<16x128xf32>
    %47 = arith.mulf %28, %34 : vector<16x128xf32>
    %48 = arith.subf %46, %47 : vector<16x128xf32>
    %49 = arith.addf %45, %48 : vector<16x128xf32>
    %c0_45 = arith.constant 0 : index
    %c0_46 = arith.constant 0 : index
    %c0_47 = arith.constant 0 : index
    %50 = vector.load %arg14[%c0_45, %c0_46, %c0_47] : memref<1x16x128xf32, #tpu.memory_space<vmem>>, vector<1x16x128xf32>
    %51 = vector.shape_cast %50 : vector<1x16x128xf32> to vector<16x128xf32>
    %52 = vector.shape_cast %49 : vector<16x128xf32> to vector<1x16x128xf32>
    tpu.vector_store %arg14[%c0_45, %c0_46, %c0_47], %52 {strides = array<i32>} : memref<1x16x128xf32, #tpu.memory_space<vmem>>, vector<1x16x128xf32>,
    return
  }
  func.func @transform_0(%arg0: i32, %arg1: i32) -> (i32, i32, i32, i32) {
    %c0_i32 = arith.constant 0 : i32
    %c0_i32_0 = arith.constant 0 : i32
    %c0_i32_1 = arith.constant 0 : i32
    return %arg0, %arg1, %c0_i32, %c0_i32_0 : i32, i32, i32, i32
  }
  func.func @transform_1(%arg0: i32, %arg1: i32) -> (i32, i32, i32, i32) {
    %c0_i32 = arith.constant 0 : i32
    %c0_i32_0 = arith.constant 0 : i32
    %c0_i32_1 = arith.constant 0 : i32
    return %arg0, %arg1, %c0_i32, %c0_i32_0 : i32, i32, i32, i32
  }
  func.func @transform_2(%arg0: i32, %arg1: i32) -> (i32, i32, i32) {
    %c0_i32 = arith.constant 0 : i32
    %c0_i32_0 = arith.constant 0 : i32
    %c0_i32_1 = arith.constant 0 : i32
    return %arg0, %c0_i32, %c0_i32_0 : i32, i32, i32
  }
  func.func @transform_3(%arg0: i32, %arg1: i32) -> (i32, i32, i32, i32) {
    %c0_i32 = arith.constant 0 : i32
    %c0_i32_0 = arith.constant 0 : i32
    %c0_i32_1 = arith.constant 0 : i32
    return %arg0, %arg1, %c0_i32, %c0_i32_0 : i32, i32, i32, i32
  }
  func.func @transform_4(%arg0: i32, %arg1: i32) -> (i32, i32, i32, i32) {
    %c0_i32 = arith.constant 0 : i32
    %c0_i32_0 = arith.constant 0 : i32
    %c0_i32_1 = arith.constant 0 : i32
    return %arg0, %arg1, %c0_i32, %c0_i32_0 : i32, i32, i32, i32
  }
  func.func @transform_5(%arg0: i32, %arg1: i32) -> (i32, i32) {
    %c0_i32 = arith.constant 0 : i32
    %c0_i32_0 = arith.constant 0 : i32
    %c0_i32_1 = arith.constant 0 : i32
    return %c0_i32, %c0_i32_0 : i32, i32
  }
  func.func @transform_6(%arg0: i32, %arg1: i32) -> (i32, i32) {
    %c0_i32 = arith.constant 0 : i32
    %c0_i32_0 = arith.constant 0 : i32
    %c0_i32_1 = arith.constant 0 : i32
    return %c0_i32, %c0_i32_0 : i32, i32
  }
  func.func @transform_7(%arg0: i32, %arg1: i32) -> (i32, i32) {
    %c0_i32 = arith.constant 0 : i32
    %c0_i32_0 = arith.constant 0 : i32
    %c0_i32_1 = arith.constant 0 : i32
    return %c0_i32, %c0_i32_0 : i32, i32
  }
  func.func @transform_8(%arg0: i32, %arg1: i32) -> (i32, i32) {
    %c0_i32 = arith.constant 0 : i32
    %c0_i32_0 = arith.constant 0 : i32
    %c0_i32_1 = arith.constant 0 : i32
    return %c0_i32, %c0_i32_0 : i32, i32
  }
  func.func @transform_9(%arg0: i32, %arg1: i32) -> (i32, i32) {
    %c0_i32 = arith.constant 0 : i32
    %c0_i32_0 = arith.constant 0 : i32
    %c0_i32_1 = arith.constant 0 : i32
    return %c0_i32, %c0_i32_0 : i32, i32
  }
  func.func @transform_10(%arg0: i32, %arg1: i32) -> (i32, i32) {
    %c0_i32 = arith.constant 0 : i32
    %c0_i32_0 = arith.constant 0 : i32
    %c0_i32_1 = arith.constant 0 : i32
    return %c0_i32, %c0_i32_0 : i32, i32
  }
  func.func @transform_11(%arg0: i32, %arg1: i32) -> (i32, i32, i32) {
    %c0_i32 = arith.constant 0 : i32
    %c0_i32_0 = arith.constant 0 : i32
    %c0_i32_1 = arith.constant 0 : i32
    return %arg0, %c0_i32, %c0_i32_0 : i32, i32, i32
  }
  func.func @transform_12(%arg0: i32, %arg1: i32) -> (i32, i32, i32) {
    %c0_i32 = arith.constant 0 : i32
    %c0_i32_0 = arith.constant 0 : i32
    %c0_i32_1 = arith.constant 0 : i32
    return %arg0, %c0_i32, %c0_i32_0 : i32, i32, i32
  }
}

</mosaic_0001>

<bundles_post_ra>
// kernel: tpu_custom_call.1
= control target key start
LH: loop header
LB: loop body
LE: loop exit
PB: predicated region body
PF: predicated region fallthrough
CT: control target
= control target key end

     0   :  { %s3356_s0 = inlined_call_operand.hbm [shape: f32[2,4,16,128], index: 0, kind: input, shape index: {}]   ;;  %s3357_s1 = inlined_call_operand.hbm [shape: f32[2,4,16,128], index: 1, kind: input, shape index: {}]   ;;  %s3358_s2 = inlined_call_operand.hbm [shape: f32[2,16,128], index: 2, kind: input, shape index: {}]   ;;  %s3359_s3 = inlined_call_operand.hbm [shape: f32[2,4,16,128], index: 3, kind: input, shape index: {}]   ;;  %s3360_s4 = inlined_call_operand.hbm [shape: f32[2,4,16,128], index: 4, kind: input, shape index: {}]   ;;  %s3361_s5 = inlined_call_operand.vmem [shape: f32[16,16], index: 5, kind: input, shape index: {}]   ;;  %s3362_s6 = inlined_call_operand.hbm [shape: f32[16,16], index: 6, kind: input, shape index: {}]   ;;  %s3363_s7 = inlined_call_operand.hbm [shape: f32[16,16], index: 7, kind: input, shape index: {}]   ;;  %s3364_s8 = inlined_call_operand.hbm [shape: f32[128,128], index: 8, kind: input, shape index: {}]   ;;  %s3365_s9 = inlined_call_operand.hbm [shape: f32[128,128], index: 9, kind: input, shape index: {}]   ;;  %s3366_s10 = inlined_call_operand.hbm [shape: f32[128,128], index: 10, kind: input, shape index: {}]   ;;  %s3367_s11 = inlined_call_operand.hbm [shape: f32[2,16,128], index: 11, kind: output, shape index: {0}]   ;;  %s3368_s12 = inlined_call_operand.hbm [shape: f32[2,16,128], index: 12, kind: output, shape index: {1}]  }
   0x1   :  { %3405 = sst [smem:[#allocation44_spill]] %s3356_s0 }
   0x2   :  { %3406 = sst [smem:[#allocation45_spill]] %s3357_s1 }
   0x3   :  { %3407 = sst [smem:[#allocation46_spill]] %s3358_s2 }
   0x4   :  { %3408 = sst [smem:[#allocation47_spill]] %s3359_s3 }
   0x5   :  { %3409 = sst [smem:[#allocation48_spill]] %s3360_s4 }
   0x6   :  { %3410 = sst [smem:[#allocation49_spill]] %s3361_s5 }
   0x7   :  { %3411 = sst [smem:[#allocation50_spill]] %s3362_s6 }
   0x8   :  { %3412 = sst [smem:[#allocation51_spill]] %s3363_s7 }
   0x9   :  { %3413 = sst [smem:[#allocation52_spill]] %s3364_s8 }
   0xa   :  { %3414 = sst [smem:[#allocation53_spill]] %s3365_s9 }
   0xb   :  { %3415 = sst [smem:[#allocation54_spill]] %s3367_s11 }
   0xc   :  { %3416 = sst [smem:[#allocation55_spill]] %s3368_s12 }
   0xd   :  { %18 = vsyncpa [#allocation3], 0 }
   0xe   :  { %20 = vsyncpa [#allocation3 + $0x1], 0 }
   0xf   :  { %21 = vsyncpa [#allocation6], 0 }
  0x10   :  { %23 = vsyncpa [#allocation6 + $0x1], 0 }
  0x11   :  { %24 = vsyncpa [#allocation9], 0 }
  0x12   :  { %26 = vsyncpa [#allocation9 + $0x1], 0 }
  0x13   :  { %27 = vsyncpa [#allocation12], 0 }
  0x14   :  { %28 = vsyncpa [#allocation15], 0 }
  0x15   :  { %29 = vsyncpa [#allocation18], 0 }
  0x16   :  { %30 = vsyncpa [#allocation4], 0 }
  0x17   :  { %32 = vsyncpa [#allocation4 + $0x1], 0 }
  0x18   :  { %33 = vsyncpa [#allocation21], 0 }
  0x19   :  { %35 = vsyncpa [#allocation21 + $0x1], 0  ;;  %s2674_s21 = smov 0   ;;  %s2676_s22 = smov 0  }
  0x1a   :  { %s2678_s23 = smov 0   ;;  %s2680_s24 = smov 0  }
  0x1b   :  { %s2682_s25 = smov 0   ;;  %s2684_s26 = smov 0  }
  0x1c   :  { %s2686_s27 = smov 0   ;;  %s2688_s28 = smov 0  }
  0x1d   :  { %s2690_s29 = smov 0   ;;  %s2692_s30 = smov 0  }
  0x1e   :  { %s2694_s13 = smov 0  }
  0x1f LB: > { %3417 = sst [smem:[#allocation31_spill]] %s2550_s21  ;;  %s2730_s14 = sadd.s32 4294967295, %s2590_s13   ;;  %s2590_s13 = sphi %s2694_s13, %s41_s13   ;;  %s2586_s30 = sphi %s2692_s30, %s3497_s30   ;;  %s2582_s29 = sphi %s2690_s29, %s3496_s29   ;;  %s2578_s28 = sphi %s2688_s28, %s3495_s28   ;;  %s2574_s27 = sphi %s2686_s27, %s3494_s27   ;;  %s2570_s26 = sphi %s2684_s26, %s3501_s26   ;;  %s2566_s25 = sphi %s2682_s25, %s3500_s25   ;;  %s2562_s24 = sphi %s2680_s24, %s3492_s24   ;;  %s2558_s23 = sphi %s2678_s23, %s3499_s23   ;;  %s2554_s22 = sphi %s2676_s22, %s3498_s22   ;;  %s2550_s21 = sphi %s2674_s21, %s3491_s21  }
  0x20   : > { %3418 = sst [smem:[#allocation32_spill]] %s2554_s22  ;;  %p1582_p0 = scmp.ge.s32.totalorder %s2590_s13, 1 }
  0x21   : > { %3419 = sst [smem:[#allocation33_spill]] %s2566_s25  ;;  %p3373_p1 = scmp.eq.s32.totalorder %s2730_s14, 0 }
  0x22   : > { %3420 = sst [smem:[#allocation34_spill]] %s2574_s27  ;;  %p374_p2 = scmp.lt.s32.totalorder %s2590_s13, 9 }
  0x23   : > { %3421 = sst [smem:[#allocation35_spill]] %s2578_s28  ;;  %s2592_s16 = smov [#allocation11]  }
  0x24   : > { %3422 = sst [smem:[#allocation36_spill]] %s2582_s29  ;;  %p2735_p3 = pnand %p1582_p0, %p374_p2 }
  0x25   : > { %3423 = sst [smem:[#allocation37_spill]] %s2586_s30  ;;  %s389_s17 = sshll.u32 %s2592_s16, 4  ;;  %s390_s17 = int_to_ptr.vmem [resolvable:$true] %s389_s17 }
  0x26   : > { %s3424_s15 = scalar_select %p2735_p3, 1, 0 }
  0x27   : > { %p1973_p4 = pneg %p2735_p3  ;;  %s2593_s19 = smov [#allocation14]  }
  0x28   : > { %3425 = sst [smem:[#allocation38_spill]] %s3424_s15  ;;  %s415_s20 = sshll.u32 %s2593_s19, 4  ;;  %s2747_s20 = int_to_ptr.vmem [resolvable:$true] %s415_s20 }
  0x29   : > { %p2743_p5 = pnand %p1973_p4, %p3373_p1  ;;  %s3427_s6 = sld [smem:[#allocation50_spill]] }
  0x2b   : > { %s3426_s18 = scalar_select %p2743_p5, 1, 0 }
  0x2c   : > { %p2757_p7 = pneg %p2743_p5 }
  0x2e   : > { %s3428_s16 = scalar_select %p2757_p7, 1, 0 }
  0x2f   : > { %s2122_s28 = scalar_lea.hbm %s3427_s6, 256 }
  0x30   : > { %p2123_p6 = scmp.ne.s32.totalorder %s3427_s6, %s2122_s28  ;;  %p2129_p10 = scmp.lt.u32.totalorder %s2122_s28, %s3427_s6 }
  0x32   : > { %p2125_p8 = pnand %p2757_p7, %p2123_p6 }
  0x34   : > { %p2126_p9 = pneg %p2125_p8 }
  0x36   : > { %p2131_p11 = pnand %p2129_p10, %p2126_p9 }
  0x38   : > { %2134 = shalt.err (!%p2131_p11)
}
  0x39   : > { %s2135_s11 = scalar_lea.vmem %s390_s17, 256  ;;  %p2143_p2 = scmp.lt.s32.totalorder %s390_s17, %s390_s17 }
  0x3a   : > { %p2136_p12 = scmp.ne.s32.totalorder %s390_s17, %s2135_s11  ;;  %p2144_p4 = scmp.lt.s32.totalorder %s2135_s11, %s2135_s11 }
  0x3c   : > { %p2138_p13 = pnand %p2136_p12, %p2757_p7  ;;  %p2145_p1 = por %p2144_p4, %p2143_p2 }
  0x3e   : > { %p2139_p0 = pneg %p2138_p13 }
  0x40   : > { %p2146_p3 = pnand %p2145_p1, %p2139_p0 }
  0x42   : > { %2149 = shalt.err (!%p2146_p3)
}
  0x43   : > { %s3378_s5 = smov 128   ;;  %s3380_s12 = smov 8  }
  0x44   : > { %1976 = dma.hbm_to_vmem [thread:$0]  (!%p2743_p5), %s3427_s6, 256, %s390_s17, [#allocation12], %s3378_s5, %s3378_s5, %s3380_s12  }
  0x45   : > { %s3429_s8 = sld [smem:[#allocation52_spill]] }
  0x4b   : > { %s2150_s4 = scalar_lea.hbm %s3429_s8, 2048 }
  0x4c   : > { %p2151_p1 = scmp.ne.s32.totalorder %s3429_s8, %s2150_s4  ;;  %p2157_p8 = scmp.lt.u32.totalorder %s2150_s4, %s3429_s8 }
  0x4e   : > { %p2153_p3 = pnand %p2151_p1, %p2757_p7 }
  0x50   : > { %p2154_p6 = pneg %p2153_p3 }
  0x52   : > { %p2159_p9 = pnand %p2157_p8, %p2154_p6 }
  0x54   : > { %2162 = shalt.err (!%p2159_p9)
}
  0x55   : > { %s2163_s17 = scalar_lea.vmem %s2747_s20, 2048  ;;  %p2171_p13 = scmp.lt.s32.totalorder %s2747_s20, %s2747_s20 }
  0x56   : > { %p2164_p10 = scmp.ne.s32.totalorder %s2747_s20, %s2163_s17  ;;  %p2172_p0 = scmp.lt.s32.totalorder %s2163_s17, %s2163_s17 }
  0x58   : > { %p2166_p11 = pnand %p2164_p10, %p2757_p7  ;;  %p2173_p2 = por %p2172_p0, %p2171_p13 }
  0x5a   : > { %p2167_p12 = pneg %p2166_p11 }
  0x5c   : > { %p2174_p4 = pnand %p2173_p2, %p2167_p12 }
  0x5e   : > { %2177 = shalt.err (!%p2174_p4)
}
  0x5f   : > { %1982 = dma.hbm_to_vmem [thread:$0]  (!%p2743_p5), %s3429_s8, 2048, %s2747_s20, [#allocation15], %s3378_s5, %s3378_s5, %s3380_s12  }
  0x60   : > { %s50_s21 = sadd.s32 1, %s2582_s29  ;;  %s53_s22 = sadd.s32 1, %s2586_s30 }
  0x61   : > { %p51_p1 = scmp.ge.s32.totalorder %s50_s21, 4  ;;  %s62_s27 = sadd.s32 1, %s2570_s26 }
  0x62   : > { %p69_p3 = scmp.ne.s32.totalorder %s2570_s26, %s2566_s25  ;;  %p3387_p6 = scmp.eq.s32.totalorder %s2590_s13, 0 }
  0x63   : > { %s3503_s21 = smov (%p51_p1, %s50_s21), 0  ;;  %s3505_s22 = smov (!%p51_p1, %s53_s22), %s2586_s30 }
  0x64   : > { %3430 = sst [smem:[#allocation39_spill]] %s3503_s21  ;;  %s58_s28 = ssub.s32 %s2582_s29, %s3503_s21 }
  0x65   : > { %p2815_p8 = por %p3387_p6, %p69_p3  ;;  %p55_p9 = scmp.ge.s32.totalorder %s3505_s22, 2 }
  0x66   : > { %p75_p10 = scmp.ne.s32.totalorder %s2566_s25, %s2562_s24  ;;  %p3386_p11 = scmp.lt.s32.totalorder %s2590_s13, 8 }
  0x67   : > { %s3382_s15 = sand.u32 1, %s2570_s26   ;;  %s3507_s22 = smov (%p55_p9, %s3505_s22), 0 }
  0x68   : > { %3432 = sst [smem:[#allocation40_spill]] %s3507_s22  ;;  %p3433_p12 = scmp.eq.s32.totalorder %s2730_s14, 0 }
  0x69   : > { %s2833_s11 = sshll.u32 %s3382_s15, 4  ;;  %s2837_s17 = ssub.s32 %s2586_s30, %s3507_s22 }
  0x6a   : > { %p2827_p13 = por %p3433_p12, %p75_p10  ;;  %s1590_s24 = sshll.u32 %s2582_s29, 1 }
  0x6b   : > { %s59_s2 = sor.u32 %s58_s28, %s2837_s17  ;;  %s1591_s4 = sshll.u32 %s2586_s30, 3 }
  0x6c   : > { %s3434_s19 = scalar_select %p2827_p13, 1, 0 }
  0x6d   : > { %p60_p2 = scmp.eq.s32.totalorder %s59_s2, 0  ;;  %s465_s5 = sadd.s32 %s1591_s4, %s1590_s24 }
  0x6e   : > { %3435 = sst [smem:[#allocation41_spill]] %s3434_s19  ;;  %p2847_p4 = pnand %p3386_p11, %p2815_p8 }
  0x6f   : > { %s2852_s15 = scalar_select %p60_p2, %s2570_s26, %s62_s27  }
  0x70   : > { %s3436_s12 = scalar_select %p2847_p4, 1, 0 }
  0x71   : > { %3437 = sst [smem:[#allocation42_spill]] %s2852_s15  ;;  %s2854_s6 = sshll.u32 %s465_s5, 7 }
  0x72   : > { %s3388_s8 = sand.u32 1, %s2590_s13   ;;  %s3438_s1 = sld [smem:[#allocation45_spill]] }
  0x73   : > { %s482_s20 = scalar_lea.vmem [#allocation5], %s2833_s11  ;;  %s2868_s27 = scalar_lea.sflag [#allocation6], %s3388_s8 }
  0x74   : > { %s491_s24 = sshll.u32 %s482_s20, 4  ;;  %3439 = sst [smem:[#allocation43_spill]] %s2868_s27  ;;  %s2864_s24 = int_to_ptr.vmem [resolvable:$true] %s491_s24 }
  0x75   : > { %p2874_p3 = pneg %p2847_p4 }
  0x77   : > { %s3440_s2 = scalar_select %p2874_p3, 1, 0 }
  0x78   : > { %s2861_s28 = scalar_lea.hbm %s3438_s1, %s2854_s6  ;;  %s2183_s4 = scalar_lea.hbm %s3438_s1, 2048 }
  0x79   : > { %s2178_s5 = scalar_lea.hbm %s2861_s28, 256  ;;  %p2184_p10 = scmp.lt.u32.totalorder %s2861_s28, %s3438_s1 }
  0x7a   : > { %p2179_p1 = scmp.ne.s32.totalorder %s2861_s28, %s2178_s5  ;;  %p2185_p12 = scmp.lt.u32.totalorder %s2183_s4, %s2178_s5 }
  0x7b   : > { %p2187_p11 = scmp.lt.u32.totalorder %s2178_s5, %s2861_s28 }
  0x7c   : > { %p2181_p8 = pnand %p2874_p3, %p2179_p1  ;;  %p2186_p2 = por %p2185_p12, %p2184_p10 }
  0x7e   : > { %p2182_p9 = pneg %p2181_p8  ;;  %p2188_p6 = por %p2187_p11, %p2186_p2 }
  0x80   : > { %p2189_p0 = pnand %p2188_p6, %p2182_p9 }
  0x82   : > { %2192 = shalt.err (!%p2189_p0)
}
  0x83   : > { %s2193_s8 = scalar_lea.vmem %s2864_s24, 256  ;;  %s2596_s21 = smov [#allocation5]  }
  0x84   : > { %p2194_p1 = scmp.ne.s32.totalorder %s2864_s24, %s2193_s8  ;;  %s2198_s22 = sshll.u32 %s2596_s21, 4  ;;  %s2199_s22 = int_to_ptr.vmem [resolvable:$false] %s2198_s22 }
  0x85   : > { %s2200_s29 = scalar_lea.vmem %s2199_s22, 512  ;;  %p2201_p5 = scmp.lt.s32.totalorder %s2864_s24, %s2199_s22 }
  0x86   : > { %p2196_p8 = pnand %p2194_p1, %p2874_p3  ;;  %p2202_p7 = scmp.lt.s32.totalorder %s2200_s29, %s2193_s8 }
  0x88   : > { %p2197_p13 = pneg %p2196_p8  ;;  %p2203_p10 = por %p2202_p7, %p2201_p5 }
  0x8a   : > { %p2204_p12 = pnand %p2203_p10, %p2197_p13 }
  0x8c   : > { %2207 = shalt.err (!%p2204_p12)
}
  0x8d   : > { %s3441_s5 = smov 8   ;;  %s3442_s4 = smov 128  }
  0x8e   : > { %1995 = dma.hbm_to_vmem [thread:$0]  (!%p2847_p4), %s2861_s28, 256, %s2864_s24, %s2868_s27, %s3442_s4, %s3442_s4, %s3441_s5  }
  0x8f   : > { %s3443_s3 = sld [smem:[#allocation47_spill]]  ;;  %s526_s22 = scalar_lea.vmem [#allocation8], %s2833_s11 }
  0x90   : > { %s535_s29 = sshll.u32 %s526_s22, 4  ;;  %s3444_s1 = sand.u32 1, %s2590_s13   ;;  %s2908_s29 = int_to_ptr.vmem [resolvable:$true] %s535_s29 }
  0x91   : > { %s2912_s15 = scalar_lea.sflag [#allocation9], %s3444_s1 }
  0x95   : > { %s2905_s8 = scalar_lea.hbm %s3443_s3, %s2854_s6  ;;  %s2213_s20 = scalar_lea.hbm %s3443_s3, 2048 }
  0x96   : > { %s2208_s19 = scalar_lea.hbm %s2905_s8, 256  ;;  %p2214_p11 = scmp.lt.u32.totalorder %s2905_s8, %s3443_s3 }
  0x97   : > { %p2209_p5 = scmp.ne.s32.totalorder %s2905_s8, %s2208_s19  ;;  %p2215_p13 = scmp.lt.u32.totalorder %s2213_s20, %s2208_s19 }
  0x98   : > { %p2217_p9 = scmp.lt.u32.totalorder %s2208_s19, %s2905_s8 }
  0x99   : > { %p2211_p7 = pnand %p2209_p5, %p2874_p3  ;;  %p2216_p0 = por %p2215_p13, %p2214_p11 }
  0x9b   : > { %p2212_p6 = pneg %p2211_p7  ;;  %p2218_p2 = por %p2217_p9, %p2216_p0 }
  0x9d   : > { %p2219_p1 = pnand %p2218_p2, %p2212_p6 }
  0x9f   : > { %2222 = shalt.err (!%p2219_p1)
}
  0xa0   : > { %s2223_s1 = scalar_lea.vmem %s2908_s29, 256  ;;  %s2597_s22 = smov [#allocation8]  }
  0xa1   : > { %p2224_p8 = scmp.ne.s32.totalorder %s2908_s29, %s2223_s1  ;;  %s2228_s28 = sshll.u32 %s2597_s22, 4  ;;  %s2229_s28 = int_to_ptr.vmem [resolvable:$false] %s2228_s28 }
  0xa2   : > { %s2230_s25 = scalar_lea.vmem %s2229_s28, 512  ;;  %p2231_p5 = scmp.lt.s32.totalorder %s2908_s29, %s2229_s28 }
  0xa3   : > { %p2226_p10 = pnand %p2224_p8, %p2874_p3  ;;  %p2232_p7 = scmp.lt.s32.totalorder %s2230_s25, %s2223_s1 }
  0xa5   : > { %p2227_p12 = pneg %p2226_p10  ;;  %p2233_p11 = por %p2232_p7, %p2231_p5 }
  0xa7   : > { %p2234_p13 = pnand %p2233_p11, %p2227_p12 }
  0xa9   : > { %2237 = shalt.err (!%p2234_p13)
}
  0xaa   : > { %2001 = dma.hbm_to_vmem [thread:$0]  (!%p2847_p4), %s2905_s8, 256, %s2908_s29, %s2912_s15, %s3442_s4, %s3442_s4, %s3441_s5  }
  0xab   : > { %s2598_s19 = smov [#allocation13]   ;;  %s2599_s20 = smov [#allocation16]  }
  0xac   : > { %s402_s24 = sshll.u32 %s2598_s19, 4  ;;  %s428_s21 = sshll.u32 %s2599_s20, 4  ;;  %s403_s24 = int_to_ptr.vmem [resolvable:$true] %s402_s24  ;;  %s429_s21 = int_to_ptr.vmem [resolvable:$true] %s428_s21 }
  0xad   : > { %s3445_s7 = sld [smem:[#allocation51_spill]]  ;;  %p3446_p0 = scmp.ne.s32.totalorder %s3428_s16, 0 }
  0xb3   : > { %s2238_s28 = scalar_lea.hbm %s3445_s7, 256 }
  0xb4   : > { %p2239_p6 = scmp.ne.s32.totalorder %s3445_s7, %s2238_s28  ;;  %p2245_p1 = scmp.lt.u32.totalorder %s2238_s28, %s3445_s7 }
  0xb6   : > { %p2241_p9 = pnand %p2239_p6, %p3446_p0 }
  0xb8   : > { %p2242_p2 = pneg %p2241_p9 }
  0xba   : > { %p2247_p8 = pnand %p2245_p1, %p2242_p2 }
  0xbc   : > { %2250 = shalt.err (!%p2247_p8)
}
  0xbd   : > { %s2251_s8 = scalar_lea.vmem %s403_s24, 256  ;;  %p2259_p7 = scmp.lt.s32.totalorder %s403_s24, %s403_s24 }
  0xbe   : > { %p2252_p10 = scmp.ne.s32.totalorder %s403_s24, %s2251_s8  ;;  %p2260_p11 = scmp.lt.s32.totalorder %s2251_s8, %s2251_s8 }
  0xc0   : > { %p2254_p12 = pnand %p2252_p10, %p3446_p0  ;;  %p2261_p13 = por %p2260_p11, %p2259_p7 }
  0xc2   : > { %p2255_p5 = pneg %p2254_p12 }
  0xc4   : > { %p2262_p4 = pnand %p2261_p13, %p2255_p5 }
  0xc6   : > { %2265 = shalt.err (!%p2262_p4)
}
  0xc7   : > { %p3447_p6 = scmp.ne.s32.totalorder %s3426_s18, 0  ;;  %s3448_s9 = sld [smem:[#allocation53_spill]] }
  0xc9   : > { %1979 = dma.hbm_to_vmem [thread:$0]  (!%p3447_p6), %s3445_s7, 256, %s403_s24, [#allocation12], %s3442_s4, %s3442_s4, %s3441_s5  }
  0xcd   : > { %s2266_s19 = scalar_lea.hbm %s3448_s9, 2048 }
  0xce   : > { %p2267_p9 = scmp.ne.s32.totalorder %s3448_s9, %s2266_s19  ;;  %p2273_p1 = scmp.lt.u32.totalorder %s2266_s19, %s3448_s9 }
  0xd0   : > { %p2269_p4 = pnand %p2267_p9, %p3446_p0 }
  0xd2   : > { %p2270_p2 = pneg %p2269_p4 }
  0xd4   : > { %p2275_p8 = pnand %p2273_p1, %p2270_p2 }
  0xd6   : > { %2278 = shalt.err (!%p2275_p8)
}
  0xd7   : > { %s2279_s25 = scalar_lea.vmem %s429_s21, 2048  ;;  %p2287_p7 = scmp.lt.s32.totalorder %s429_s21, %s429_s21 }
  0xd8   : > { %p2280_p10 = scmp.ne.s32.totalorder %s429_s21, %s2279_s25  ;;  %p2288_p11 = scmp.lt.s32.totalorder %s2279_s25, %s2279_s25 }
  0xda   : > { %p2282_p12 = pnand %p2280_p10, %p3446_p0  ;;  %p2289_p13 = por %p2288_p11, %p2287_p7 }
  0xdc   : > { %p2283_p5 = pneg %p2282_p12 }
  0xde   : > { %p2290_p3 = pnand %p2289_p13, %p2283_p5 }
  0xe0   : > { %2293 = shalt.err (!%p2290_p3)
}
  0xe1   : > { %1985 = dma.hbm_to_vmem [thread:$0]  (!%p3447_p6), %s3448_s9, 2048, %s429_s21, [#allocation15], %s3442_s4, %s3442_s4, %s3441_s5  }
  0xe2   : > { %s2600_s3 = smov [#allocation17]   ;;  %s2294_s19 = scalar_lea.hbm %s3366_s10, 2048 }
  0xe3   : > { %s441_s30 = sshll.u32 %s2600_s3, 4  ;;  %p2295_p3 = scmp.ne.s32.totalorder %s3366_s10, %s2294_s19  ;;  %s442_s30 = int_to_ptr.vmem [resolvable:$true] %s441_s30 }
  0xe4   : > { %p2301_p2 = scmp.lt.u32.totalorder %s2294_s19, %s3366_s10 }
  0xe5   : > { %p2297_p9 = pnand %p2295_p3, %p3446_p0 }
  0xe7   : > { %p2298_p4 = pneg %p2297_p9 }
  0xe9   : > { %p2303_p1 = pnand %p2301_p2, %p2298_p4 }
  0xeb   : > { %2306 = shalt.err (!%p2303_p1)
}
  0xec   : > { %s2307_s21 = scalar_lea.vmem %s442_s30, 2048  ;;  %p2315_p5 = scmp.lt.s32.totalorder %s442_s30, %s442_s30 }
  0xed   : > { %p2308_p8 = scmp.ne.s32.totalorder %s442_s30, %s2307_s21  ;;  %p2316_p7 = scmp.lt.s32.totalorder %s2307_s21, %s2307_s21 }
  0xef   : > { %p2310_p10 = pnand %p2308_p8, %p3446_p0  ;;  %p2317_p11 = por %p2316_p7, %p2315_p5 }
  0xf1   : > { %p2311_p12 = pneg %p2310_p10 }
  0xf3   : > { %p2318_p13 = pnand %p2317_p11, %p2311_p12 }
  0xf5   : > { %2321 = shalt.err (!%p2318_p13)
}
  0xf6   : > { %1988 = dma.hbm_to_vmem [thread:$0]  (!%p3447_p6), %s3366_s10, 2048, %s442_s30, [#allocation18], %s3442_s4, %s3442_s4, %s3441_s5  }
  0xf7   : > { %s3449_s0 = sld [smem:[#allocation44_spill]]  ;;  %s459_s18 = scalar_lea.vmem [#allocation2], %s2833_s11 }
  0xf8   : > { %s468_s27 = sshll.u32 %s459_s18, 4  ;;  %s3450_s29 = sand.u32 1, %s2570_s26   ;;  %s3009_s27 = int_to_ptr.vmem [resolvable:$true] %s468_s27 }
  0xf9   : > { %s3013_s19 = scalar_lea.sflag [#allocation3], %s3450_s29  ;;  %p3451_p3 = scmp.ne.s32.totalorder %s3440_s2, 0 }
  0xfd   : > { %s3006_s3 = scalar_lea.hbm %s3449_s0, %s2854_s6  ;;  %s2327_s1 = scalar_lea.hbm %s3449_s0, 2048 }
  0xfe   : > { %s2322_s20 = scalar_lea.hbm %s3006_s3, 256  ;;  %p2328_p4 = scmp.lt.u32.totalorder %s3006_s3, %s3449_s0 }
  0xff   : > { %p2323_p0 = scmp.ne.s32.totalorder %s3006_s3, %s2322_s20  ;;  %p2329_p2 = scmp.lt.u32.totalorder %s2327_s1, %s2322_s20 }
 0x100   : > { %p2331_p8 = scmp.lt.u32.totalorder %s2322_s20, %s3006_s3 }
 0x101   : > { %p2325_p6 = pnand %p2323_p0, %p3451_p3  ;;  %p2330_p1 = por %p2329_p2, %p2328_p4 }
 0x103   : > { %p2326_p9 = pneg %p2325_p6  ;;  %p2332_p10 = por %p2331_p8, %p2330_p1 }
 0x105   : > { %p2333_p12 = pnand %p2332_p10, %p2326_p9 }
 0x107   : > { %2336 = shalt.err (!%p2333_p12)
}
 0x108   : > { %s2337_s25 = scalar_lea.vmem %s3009_s27, 256  ;;  %s2601_s24 = smov [#allocation2]  }
 0x109   : > { %p2338_p5 = scmp.ne.s32.totalorder %s3009_s27, %s2337_s25  ;;  %s2342_s16 = sshll.u32 %s2601_s24, 4  ;;  %s2343_s16 = int_to_ptr.vmem [resolvable:$false] %s2342_s16 }
 0x10a   : > { %s2344_s8 = scalar_lea.vmem %s2343_s16, 512  ;;  %p2345_p13 = scmp.lt.s32.totalorder %s3009_s27, %s2343_s16 }
 0x10b   : > { %p2340_p7 = pnand %p2338_p5, %p3451_p3  ;;  %p2346_p0 = scmp.lt.s32.totalorder %s2344_s8, %s2337_s25 }
 0x10d   : > { %p2341_p11 = pneg %p2340_p7  ;;  %p2347_p6 = por %p2346_p0, %p2345_p13 }
 0x10f   : > { %p2348_p4 = pnand %p2347_p6, %p2341_p11 }
 0x111   : > { %2351 = shalt.err (!%p2348_p4)
}
 0x112   : > { %p3452_p9 = scmp.ne.s32.totalorder %s3436_s12, 0  ;;  %s3453_s18 = sld [smem:[#allocation32_spill]] }
 0x113   : > { %s3454_s29 = sld [smem:[#allocation31_spill]]  ;;  %s3455_s20 = sld [smem:[#allocation37_spill]] }
 0x114   : > { %1992 = dma.hbm_to_vmem [thread:$0]  (!%p3452_p9), %s3006_s3, 256, %s3009_s27, %s3013_s19, %s3442_s4, %s3442_s4, %s3441_s5  }
 0x115   : > { %s1581_s30 = sadd.s32 4294967294, %s2590_s13   ;;  %s116_s22 = sadd.s32 1, %s2558_s23 }
 0x116   : > { %p3456_p1 = scmp.eq.s32.totalorder %s2837_s17, 0  ;;  %p3457_p8 = scmp.eq.s32.totalorder %s2590_s13, 0 }
 0x117   : > { %p335_p5 = scmp.eq.s32.totalorder %s2730_s14, 7  ;;  %p341_p7 = scmp.eq.s32.totalorder %s1581_s30, 7 }
 0x118   : > { %p123_p2 = scmp.ne.s32.totalorder %s2558_s23, %s3453_s18  ;;  %p3459_p11 = scmp.eq.s32.totalorder %s2730_s14, 0 }
 0x119   : > { %s3047_s1 = scalar_select %p3456_p1, %s2558_s23, %s116_s22  }
 0x11a   : > { %p3051_p10 = por %p123_p2, %p3457_p8  ;;  %p129_p12 = scmp.ne.s32.totalorder %s3453_s18, %s3454_s29 }
 0x11b   : > { %s503_s27 = sand.u32 1, %s2558_s23   ;;  %p3065_p0 = por %p335_p5, %p123_p2 }
 0x11c   : > { %p3060_p13 = por %p129_p12, %p3459_p11  ;;  %p3069_p6 = por %p341_p7, %p129_p12 }
 0x11d   : > { %s3461_s17 = scalar_select %p3065_p0, 1, 0 }
 0x11e   : > { %s3460_s3 = scalar_select %p3060_p13, 1, 0 }
 0x11f   : > { %s3462_s19 = scalar_select %p3069_p6, 1, 0 }
 0x120   : > { %s1597_s21 = sshll.u32 %s503_s27, 4  ;;  %s1636_s25 = sshll.u32 %s3455_s20, 8 }
 0x121   : > { %s3463_s8 = sld [smem:[#allocation46_spill]]  ;;  %s505_s29 = scalar_lea.vmem [#allocation7], %s1597_s21 }
 0x122   : > { %s512_s30 = sshll.u32 %s505_s29, 4  ;;  %p3464_p4 = scmp.lt.s32.totalorder %s2590_s13, 8  ;;  %s3087_s30 = int_to_ptr.vmem [resolvable:$true] %s512_s30 }
 0x124   : > { %p3083_p2 = pnand %p3464_p4, %p3051_p10 }
 0x126   : > { %p2354_p8 = pneg %p3083_p2 }
 0x127   : > { %s3077_s18 = scalar_lea.hbm %s3463_s8, %s1636_s25  ;;  %s3466_s25 = sld [smem:[#allocation48_spill]] }
 0x128   : > { %s2352_s0 = scalar_lea.hbm %s3077_s18, 256  ;;  %s2357_s29 = scalar_lea.hbm %s3463_s8, 512 }
 0x129   : > { %p2353_p1 = scmp.ne.s32.totalorder %s3077_s18, %s2352_s0  ;;  %p2358_p5 = scmp.lt.u32.totalorder %s3077_s18, %s3463_s8 }
 0x12a   : > { %p2359_p7 = scmp.lt.u32.totalorder %s2357_s29, %s2352_s0  ;;  %p2361_p4 = scmp.lt.u32.totalorder %s2352_s0, %s3077_s18 }
 0x12b   : > { %p2355_p12 = pnand %p2354_p8, %p2353_p1 }
 0x12c   : > { %p2360_p11 = por %p2359_p7, %p2358_p5 }
 0x12d   : > { %s3467_s16 = smov %s3466_s25  ;;  %s3093_s24 = scalar_lea.hbm %s3466_s25, %s2854_s6 }
 0x12e   : > { %p2356_p10 = pneg %p2355_p12  ;;  %p2362_p6 = por %p2361_p4, %p2360_p11 }
 0x130   : > { %p2363_p0 = pnand %p2362_p6, %p2356_p10 }
 0x132   : > { %2366 = shalt.err (!%p2363_p0)
}
 0x133   : > { %s2367_s6 = scalar_lea.vmem %s3087_s30, 256  ;;  %s2602_s20 = smov [#allocation7]  }
 0x134   : > { %p2368_p1 = scmp.ne.s32.totalorder %s3087_s30, %s2367_s6  ;;  %s2372_s27 = sshll.u32 %s2602_s20, 4  ;;  %s2373_s27 = int_to_ptr.vmem [resolvable:$false] %s2372_s27 }
 0x135   : > { %s2374_s7 = scalar_lea.vmem %s2373_s27, 512  ;;  %p2375_p9 = scmp.lt.s32.totalorder %s3087_s30, %s2373_s27 }
 0x136   : > { %p2370_p12 = pnand %p2368_p1, %p2354_p8  ;;  %p2376_p5 = scmp.lt.s32.totalorder %s2374_s7, %s2367_s6 }
 0x138   : > { %p2371_p13 = pneg %p2370_p12  ;;  %p2377_p7 = por %p2376_p5, %p2375_p9 }
 0x13a   : > { %p2378_p11 = pnand %p2377_p7, %p2371_p13 }
 0x13c   : > { %2381 = shalt.err (!%p2378_p11)
}
 0x13d   : > { %s3468_s0 = sld [smem:[#allocation43_spill]]  ;;  %s549_s9 = scalar_lea.vmem [#allocation10], %s2833_s11 }
 0x13e   : > { %s558_s25 = sshll.u32 %s549_s9, 4  ;;  %s2382_s28 = scalar_lea.hbm %s3093_s24, 256  ;;  %s3125_s25 = int_to_ptr.vmem [resolvable:$true] %s558_s25 }
 0x13f   : > { %p2383_p9 = scmp.ne.s32.totalorder %s3093_s24, %s2382_s28  ;;  %s2387_s29 = scalar_lea.hbm %s3467_s16, 2048 }
 0x140   : > { %p2388_p6 = scmp.lt.u32.totalorder %s3093_s24, %s3467_s16  ;;  %p2389_p8 = scmp.lt.u32.totalorder %s2387_s29, %s2382_s28 }
 0x141   : > { %p2385_p13 = pnand %p2383_p9, %p3451_p3 }
 0x142   : > { %p2390_p10 = por %p2389_p8, %p2388_p6 }
 0x143   : > { %1998 = dma.hbm_to_vmem [thread:$0]  (!%p3083_p2), %s3077_s18, 256, %s3087_s30, %s3468_s0, %s3442_s4, %s3442_s4, %s3441_s5  }
 0x144   : > { %p2386_p0 = pneg %p2385_p13  ;;  %p2391_p2 = scmp.lt.u32.totalorder %s2382_s28, %s3093_s24 }
 0x146   : > { %p2392_p4 = por %p2391_p2, %p2390_p10 }
 0x148   : > { %p2393_p1 = pnand %p2392_p4, %p2386_p0 }
 0x14a   : > { %2396 = shalt.err (!%p2393_p1)
}
 0x14b   : > { %s2397_s11 = scalar_lea.vmem %s3125_s25, 256  ;;  %s2603_s18 = smov [#allocation10]  }
 0x14c   : > { %p2398_p12 = scmp.ne.s32.totalorder %s3125_s25, %s2397_s11  ;;  %s2402_s30 = sshll.u32 %s2603_s18, 4  ;;  %s2403_s30 = int_to_ptr.vmem [resolvable:$false] %s2402_s30 }
 0x14d   : > { %s2404_s27 = scalar_lea.vmem %s2403_s30, 512  ;;  %p2405_p11 = scmp.lt.s32.totalorder %s3125_s25, %s2403_s30 }
 0x14e   : > { %p2400_p5 = pnand %p2398_p12, %p3451_p3  ;;  %p2406_p9 = scmp.lt.s32.totalorder %s2404_s27, %s2397_s11 }
 0x150   : > { %p2401_p7 = pneg %p2400_p5  ;;  %p2407_p13 = por %p2406_p9, %p2405_p11 }
 0x152   : > { %p2408_p6 = pnand %p2407_p13, %p2401_p7 }
 0x154   : > { %2411 = shalt.err (!%p2408_p6)
}
 0x155   : > { %p3469_p0 = scmp.ne.s32.totalorder %s3436_s12, 0  ;;  %s3470_s2 = sld [smem:[#allocation38_spill]] }
 0x157   : > { %2004 = dma.hbm_to_vmem [thread:$0]  (!%p3469_p0), %s3093_s24, 256, %s3125_s25, %s2912_s15, %s3442_s4, %s3442_s4, %s3441_s5  }
 0x15b   : > { %p3471_p3 = scmp.ne.s32.totalorder %s3470_s2, 0 }
 0x15c   : > { %s3472_s7 = sld [smem:[#allocation33_spill]] (!%p3471_p3)  ;;  %s3473_s0 = sld [smem:[#allocation41_spill]] (!%p3471_p3) }
 0x15d   : > { %570 = sbr.rel (%p3471_p3) target bundleno = 953 (0x3b9), region = 64 }
 0x162   : > { %s572_s9 = sand.u32 (!%p3471_p3), 1, %s3472_s7   ;;  %p3474_p8 = scmp.ne.s32.totalorder (!%p3471_p3), %s3473_s0, 0 }
 0x163   : > { %s3155_s28 = sshll.u32 (!%p3471_p3), %s572_s9, 4  ;;  %s573_s22 = scalar_lea.sflag (!%p3471_p3), [#allocation3], %s572_s9 }
 0x164   : > { %s576_s21 = scalar_lea.vmem [#allocation2], %s3155_s28 }
 0x165   : > { %2513 = dma.done.wait (%p3474_p8), %s573_s22, 256  }
 0x166   : > { %2515 = vsyncadd (%p3474_p8), %s573_s22, 4294967040  ;;  %s581_s12 = sand.u32 1, %s2730_s14   ;;  %s585_s5 = scalar_lea.vmem [#allocation5], %s3155_s28 }
 0x167   : > { %s582_s15 = scalar_lea.sflag [#allocation6], %s581_s12 }
 0x168   : > { %2517 = dma.done.wait (%p3474_p8), %s582_s15, 256  }
 0x169   : > { %2519 = vsyncadd (%p3474_p8), %s582_s15, 4294967040  ;;  %s3475_s4 = sld [smem:[#allocation32_spill]]  ;;  %p3476_p10 = scmp.ne.s32.totalorder %s3460_s3, 0 }
 0x16f   : > { %s3169_s24 = sand.u32 1, %s3475_s4  }
 0x170   : > { %s3172_s25 = sshll.u32 %s3169_s24, 4 }
 0x171   : > { %s594_s29 = scalar_lea.vmem [#allocation7], %s3172_s25 }
 0x172   : > { %2521 = dma.done.wait (%p3476_p10), %s582_s15, 256  }
 0x173   : > { %2523 = vsyncadd (%p3476_p10), %s582_s15, 4294967040  ;;  %s600_s6 = scalar_lea.sflag [#allocation9], %s581_s12  ;;  %s603_s20 = scalar_lea.vmem [#allocation8], %s3155_s28 }
 0x174   : > { %2525 = dma.done.wait (%p3474_p8), %s600_s6, 512  }
 0x175   : > { %2527 = vsyncadd (%p3474_p8), %s600_s6, 4294966784  ;;  %s612_s11 = scalar_lea.vmem [#allocation10], %s3155_s28  ;;  %p3477_p2 = scmp.eq.s32.totalorder %s2730_s14, 0 }
 0x177   : > { %2529 = dma.done.wait (%p3477_p2), [#allocation12], 512   ;;  %p3478_p4 = pmov %p3477_p2 }
 0x178   : > { %p3479_p1 = pmov %p3477_p2 }
 0x179   : > { %2531 = vsyncadd (%p3478_p4), [#allocation12], 4294966784 }
 0x17a   : > { %2533 = dma.done.wait (%p3479_p1), [#allocation15], 4096   ;;  %p3480_p12 = pmov %p3479_p1 }
 0x17b   : > { %p3481_p5 = pmov %p3479_p1 }
 0x17c   : > { %2535 = vsyncadd (%p3480_p12), [#allocation15], 4294963200 }
 0x17d   : > { %2537 = dma.done.wait (%p3481_p5), [#allocation18], 2048   ;;  %p3482_p7 = pmov %p3479_p1 }
 0x17e   : > { %s3198_s3 = scalar_lea.vmem [#allocation19], %s3172_s25  ;;  %s3201_s18 = scalar_lea.vmem [#allocation20], %s3172_s25 }
 0x17f   : > { %2539 = vsyncadd (%p3482_p7), [#allocation18], 4294965248  ;;  %s3483_s30 = sld [smem:[#allocation34_spill]] }
 0x185   : > { %p1621_p11 = scmp.ne.s32.totalorder %s3483_s30, 0 }
 0x186   : > { %v2604_v0 = vmov (!%p1621_p11), 0.0  }
 0x187   : > { %701 = sbr.rel (%p1621_p11) target bundleno = 398 (0x18e), region = 108  ;;  %702 = vst [vmem:[%s3198_s3] sm:$0xff] (!%p1621_p11), %v2604_v0  ;;  %703 = vst [vmem:[%s3198_s3 + $0x8] sm:$0xff] (!%p1621_p11), %v2604_v0 }
 0x188   : > { %704 = vst [vmem:[%s3201_s18] sm:$0xff] (!%p1621_p11), %v2604_v0  ;;  %705 = vst [vmem:[%s3201_s18 + $0x8] sm:$0xff] (!%p1621_p11), %v2604_v0 }
 0x18e PF: > { %v716_v1 = vld [vmem:[#allocation14] sm:$0xff]  ;;  %v717_v2 = vld [vmem:[#allocation14 + $0x8] sm:$0xff]  ;;  %v718_v6 = vld [vmem:[#allocation14 + $0x10] sm:$0xff]  ;;  %s3484_s2 = sld [smem:[#allocation49_spill]]  ;;  %vm999_vm0 = vcmask 130048   ;;  %s1302_s28 = sshll.u32 %s3198_s3, 4  ;;  %s3252_s28 = int_to_ptr.vmem [resolvable:$true] %s1302_s28 }
 0x18f   : > { %v807_v3 = vld [vmem:[#allocation16] sm:$0xff]  ;;  %v1831_v4 = vpack.c.bf16 %v717_v2, %v716_v1  ;;  %v808_v5 = vld [vmem:[#allocation16 + $0x8] sm:$0xff]  ;;  %v719_v7 = vld [vmem:[#allocation14 + $0x18] sm:$0xff]  ;;  %s3485_s9 = sld [smem:[#allocation35_spill]]  ;;  %s3486_s15 = sld [smem:[#allocation54_spill]] }
 0x190   : > { %v1863_v8 = vpack.c.bf16 %v808_v5, %v807_v3  ;;  %v1835_v9 = vpack.c.bf16 %v719_v7, %v718_v6  ;;  %v809_v10 = vld [vmem:[#allocation16 + $0x10] sm:$0xff]  ;;  %v810_v11 = vld [vmem:[#allocation16 + $0x18] sm:$0xff]  ;;  %v720_v12 = vld [vmem:[#allocation14 + $0x20] sm:$0xff]  ;;  %s1318_s4 = sshll.u32 %s3201_s18, 4  ;;  %s3487_s6 = sld [smem:[#allocation55_spill]]  ;;  %s3261_s4 = int_to_ptr.vmem [resolvable:$true] %s1318_s4 }
 0x191   : > { %1832 = vmatprep.subr.bf16.mxu0 %v1831_v4  ;;  %v1867_v13 = vpack.c.bf16 %v810_v11, %v809_v10  ;;  %v721_v14 = vld [vmem:[#allocation14 + $0x28] sm:$0xff]  ;;  %v811_v15 = vld [vmem:[#allocation16 + $0x20] sm:$0xff]  ;;  %v722_v19 = vld [vmem:[#allocation14 + $0x30] sm:$0xff]  ;;  %s2412_s30 = scalar_lea.vmem %s3252_s28, 256  ;;  %p3488_p13 = scmp.ne.s32.totalorder %s3461_s17, 0 }
 0x192   : > { %v812_v16 = vld [vmem:[#allocation16 + $0x28] sm:$0xff]  ;;  %1864 = vmatprep.subr.bf16.mxu1 %v1863_v8  ;;  %1834 = vmatpush3.bf16.msra.mxu0 %v1831_v4  ;;  %v1839_v17 = vpack.c.bf16 %v721_v14, %v720_v12  ;;  %v723_v20 = vld [vmem:[#allocation14 + $0x38] sm:$0xff]  ;;  %v813_v21 = vld [vmem:[#allocation16 + $0x30] sm:$0xff]  ;;  %p2413_p9 = scmp.ne.s32.totalorder %s3252_s28, %s2412_s30  ;;  %s2605_s14 = smov [#allocation19]  }
 0x193   : > { %1866 = vmatpush3.bf16.msra.mxu1 %v1863_v8  ;;  %1836 = vmatprep.subr.bf16.mxu0 %v1835_v9  ;;  %v1871_v18 = vpack.c.bf16 %v812_v16, %v811_v15  ;;  %v814_v22 = vld [vmem:[#allocation16 + $0x38] sm:$0xff]  ;;  %v1843_v23 = vpack.c.bf16 %v723_v20, %v722_v19  ;;  %v724_v24 = vld [vmem:[#allocation14 + $0x40] sm:$0xff]  ;;  %v725_v26 = vld [vmem:[#allocation14 + $0x48] sm:$0xff]  ;;  %s2416_s27 = sshll.u32 %s2605_s14, 4  ;;  %s2417_s27 = int_to_ptr.vmem [resolvable:$false] %s2416_s27 }
 0x194   : > { %1868 = vmatprep.subr.bf16.mxu1 %v1867_v13  ;;  %v1875_v25 = vpack.c.bf16 %v814_v22, %v813_v21  ;;  %v815_v27 = vld [vmem:[#allocation16 + $0x40] sm:$0xff]  ;;  %v816_v29 = vld [vmem:[#allocation16 + $0x48] sm:$0xff]  ;;  %v1847_v34 = vpack.c.bf16 %v725_v26, %v724_v24  ;;  %v726_v36 = vld [vmem:[#allocation14 + $0x50] sm:$0xff]  ;;  %p2414_p6 = pnand %p2413_p9, %p3488_p13  ;;  %s2418_s7 = scalar_lea.vmem %s2417_s27, 512 }
 0x195   : > { %v706_v28 = vld [vmem:[%s576_s21] sm:$0xff]  ;;  %v1879_v35 = vpack.c.bf16 %v816_v29, %v815_v27  ;;  %v727_v37 = vld [vmem:[#allocation14 + $0x58] sm:$0xff]  ;;  %v729_v43 = vld [vmem:[#allocation14 + $0x68] sm:$0xff]  ;;  %s1637_s22 = sshll.u32 %s3485_s9, 8  ;;  %p2419_p3 = scmp.lt.s32.totalorder %s3252_s28, %s2417_s27 }
 0x196   : > { %1838 = vmatpush3.bf16.msra.mxu0 %v1835_v9  ;;  %v710_v30 = vld [vmem:[%s594_s29] sm:$0xff]  ;;  %v818_v39 = vld [vmem:[#allocation16 + $0x58] sm:$0xff]  ;;  %v1851_v40 = vpack.c.bf16 %v727_v37, %v726_v36  ;;  %v820_v45 = vld [vmem:[#allocation16 + $0x68] sm:$0xff]  ;;  %p2415_p0 = pneg %p2414_p6  ;;  %p2420_p8 = scmp.lt.s32.totalorder %s2418_s7, %s2412_s30 }
 0x197   : > { %1870 = vmatpush3.bf16.msra.mxu1 %v1867_v13  ;;  %1840 = vmatprep.subr.bf16.mxu0 %v1839_v17  ;;  %v708_v31 = vld [vmem:[%s585_s5] sm:$0xff]  ;;  %v712_v32 = vmul.f32 %v710_v30, %v706_v28  ;;  %v731_v49 = vld [vmem:[#allocation14 + $0x78] sm:$0xff]  ;;  %v901_v55 = vld [vmem:[#allocation17 + $0x8] sm:$0xff] }
 0x198   : > { %1872 = vmatprep.subr.bf16.mxu1 %v1871_v18  ;;  %v714_v33 = vmul.f32 %v710_v30, %v708_v31  ;;  %v817_v38 = vld [vmem:[#allocation16 + $0x50] sm:$0xff]  ;;  %v728_v42 = vld [vmem:[#allocation14 + $0x60] sm:$0xff]  ;;  %v822_v51 = vld [vmem:[#allocation16 + $0x78] sm:$0xff]  ;;  %p2421_p10 = por %p2420_p8, %p2419_p3 }
 0x199   : > { %1737 = vmatprep.mubr.f32.mxu0 %v712_v32  ;;  %v1883_v41 = vpack.c.bf16 %v818_v39, %v817_v38  ;;  %v819_v44 = vld [vmem:[#allocation16 + $0x60] sm:$0xff]  ;;  %v1855_v46 = vpack.c.bf16 %v729_v43, %v728_v42  ;;  %v730_v48 = vld [vmem:[#allocation14 + $0x70] sm:$0xff]  ;;  %v707_v56 = vld [vmem:[%s576_s21 + $0x8] sm:$0xff] }
 0x19a   : > { %1842 = vmatpush3.bf16.msra.mxu0 %v1839_v17  ;;  %1772 = vmatprep.mubr.f32.mxu1 %v714_v33  ;;  %v1887_v47 = vpack.c.bf16 %v820_v45, %v819_v44  ;;  %v821_v50 = vld [vmem:[#allocation16 + $0x70] sm:$0xff]  ;;  %v1859_v52 = vpack.c.bf16 %v731_v49, %v730_v48  ;;  %v900_v54 = vld [vmem:[#allocation17] sm:$0xff]  ;;  %v711_v57 = vld [vmem:[%s594_s29 + $0x8] sm:$0xff]  ;;  %v898_v0 = vadd.f32 %v714_v33, %v712_v32  ;;  %p2422_p2 = pnand %p2421_p10, %p2415_p0 }
 0x19b   : > { %1874 = vmatpush3.bf16.msra.mxu1 %v1871_v18  ;;  %1844 = vmatprep.subr.bf16.mxu0 %v1843_v23  ;;  %v1891_v53 = vpack.c.bf16 %v822_v51, %v821_v50  ;;  %v709_v58 = vld [vmem:[%s585_s5 + $0x8] sm:$0xff]  ;;  %v1895_v59 = vpack.c.bf16 %v901_v55, %v900_v54  ;;  %v902_v60 = vld [vmem:[#allocation17 + $0x10] sm:$0xff]  ;;  %v713_v62 = vmul.f32 %v711_v57, %v707_v56  ;;  %v904_v2 = vld [vmem:[#allocation17 + $0x20] sm:$0xff]  ;;  %s3249_s5 = scalar_lea.hbm %s3486_s15, %s1637_s22 }
 0x19c   : > { %1876 = vmatprep.subr.bf16.mxu1 %v1875_v25  ;;  %v903_v61 = vld [vmem:[#allocation17 + $0x18] sm:$0xff]  ;;  %v715_v63 = vmul.f32 %v711_v57, %v709_v58  ;;  %v905_v3 = vld [vmem:[#allocation17 + $0x28] sm:$0xff]  ;;  %v906_v5 = vld [vmem:[#allocation17 + $0x30] sm:$0xff] }
 0x19d   : > { %v1899_v1 = vpack.c.bf16 %v903_v61, %v902_v60  ;;  %v1903_v4 = vpack.c.bf16 %v905_v3, %v904_v2  ;;  %v907_v6 = vld [vmem:[#allocation17 + $0x38] sm:$0xff]  ;;  %v908_v8 = vld [vmem:[#allocation17 + $0x40] sm:$0xff]  ;;  %v909_v9 = vld [vmem:[#allocation17 + $0x48] sm:$0xff] }
 0x19e   : > { %1846 = vmatpush3.bf16.msra.mxu0 %v1843_v23  ;;  %v1907_v7 = vpack.c.bf16 %v907_v6, %v906_v5  ;;  %v1911_v10 = vpack.c.bf16 %v909_v9, %v908_v8  ;;  %v910_v11 = vld [vmem:[#allocation17 + $0x50] sm:$0xff]  ;;  %v911_v12 = vld [vmem:[#allocation17 + $0x58] sm:$0xff]  ;;  %v912_v14 = vld [vmem:[#allocation17 + $0x60] sm:$0xff]  ;;  %v899_v20 = vadd.f32 %v715_v63, %v713_v62 }
 0x19f   : > { %1878 = vmatpush3.bf16.msra.mxu1 %v1875_v25  ;;  %1848 = vmatprep.subr.bf16.mxu0 %v1847_v34  ;;  %v1915_v13 = vpack.c.bf16 %v911_v12, %v910_v11  ;;  %v913_v15 = vld [vmem:[#allocation17 + $0x68] sm:$0xff]  ;;  %v914_v17 = vld [vmem:[#allocation17 + $0x70] sm:$0xff]  ;;  %v915_v18 = vld [vmem:[#allocation17 + $0x78] sm:$0xff] }
 0x1a0   : > { %1880 = vmatprep.subr.bf16.mxu1 %v1879_v35  ;;  %v1919_v16 = vpack.c.bf16 %v913_v15, %v912_v14  ;;  %v1923_v19 = vpack.c.bf16 %v915_v18, %v914_v17  ;;  %v997_v21 = vld [vmem:[%s3484_s2] sm:$0xff]  ;;  %v998_v29 = vld [vmem:[%s3484_s2 + $0x8] sm:$0xff]  ;;  %v1164_v42 = vld [vmem:[#allocation13] sm:$0xff] }
 0x1a1   : > { %v1081_v30 = vld [vmem:[#allocation11] sm:$0xff]  ;;  %v1165_v43 = vld [vmem:[#allocation13 + $0x8] sm:$0xff] }
 0x1a2   : > { %1850 = vmatpush3.bf16.msra.mxu0 %v1847_v34  ;;  %v1258_v54 = vld [vmem:[%s612_s11 + $0x8] sm:$0xff]  ;;  %v1255_v56 = vld [vmem:[%s603_s20] sm:$0xff] }
 0x1a3   : > { %1882 = vmatpush3.bf16.msra.mxu1 %v1879_v35  ;;  %1852 = vmatprep.subr.bf16.mxu0 %v1851_v40  ;;  %v1257_v57 = vld [vmem:[%s612_s11] sm:$0xff]  ;;  %v1260_v2 = vld [vmem:[%s3198_s3 + $0x8] sm:$0xff]  ;;  %s1284_s11 = scalar_lea.sflag [#allocation4], %s3169_s24 }
 0x1a4   : > { %1884 = vmatprep.subr.bf16.mxu1 %v1883_v41  ;;  %v1272_v3 = vld [vmem:[%s3201_s18 + $0x8] sm:$0xff]  ;;  %v1259_v8 = vld [vmem:[%s3198_s3] sm:$0xff] }
 0x1a5   : > { %v1271_v9 = vld [vmem:[%s3201_s18] sm:$0xff] }
 0x1a6   : > { %1854 = vmatpush3.bf16.msra.mxu0 %v1851_v40 }
 0x1a7   : > { %1886 = vmatpush3.bf16.msra.mxu1 %v1883_v41  ;;  %1856 = vmatprep.subr.bf16.mxu0 %v1855_v46  ;;  %v1082_v41 = vld [vmem:[#allocation11 + $0x8] sm:$0xff] }
 0x1a8   : > { %1888 = vmatprep.subr.bf16.mxu1 %v1887_v47 }
 0x1aa   : > { %1858 = vmatpush3.bf16.msra.mxu0 %v1855_v46 }
 0x1ab   : > { %1890 = vmatpush3.bf16.msra.mxu1 %v1887_v47  ;;  %1860 = vmatprep.subr.bf16.mxu0 %v1859_v52 }
 0x1ac   : > { %1892 = vmatprep.subr.bf16.mxu1 %v1891_v53 }
 0x1ae   : > { %1862 = vmatpush3.bf16.msra.mxu0 %v1859_v52 }
 0x1af   : > { %1894 = vmatpush3.bf16.msra.mxu1 %v1891_v53  ;;  %1896 = vmatprep.subr.bf16.mxu0 %v1895_v59  ;;  %v1256_v53 = vld [vmem:[%s603_s20 + $0x8] sm:$0xff]  ;;  %s3259_s20 = scalar_lea.hbm %s3487_s6, %s1637_s22 }
 0x1b1   : > { %1738 = vmatmul.mubr.f32.vlgmr.msra.gmra.mrb[0].mxu0 %v713_v62 }
 0x1b2   : > { %1773 = vmatmul.mubr.f32.vlgmr.msra.gmra.mrb[0].mxu1 %v715_v63  ;;  %1898 = vmatpush3.bf16.msra.mxu0 %v1895_v59 }
 0x1b3   : > { %1900 = vmatprep.subr.bf16.mxu0 %v1899_v1  ;;  %1807 = vmatprep.mubr.f32.mxu0 %v898_v0 }
 0x1b4   : > { %1814 = vmatprep.mubr.msk.f32.mxu1 %vm999_vm0, %v997_v21 }
 0x1b6   : > { %1902 = vmatpush3.bf16.msra.mxu0 %v1899_v1 }
 0x1b7   : > { %1904 = vmatprep.subr.bf16.mxu0 %v1903_v4 }
 0x1ba   : > { %1906 = vmatpush3.bf16.msra.mxu0 %v1903_v4 }
 0x1bb   : > { %1908 = vmatprep.subr.bf16.mxu0 %v1907_v7 }
 0x1be   : > { %1910 = vmatpush3.bf16.msra.mxu0 %v1907_v7 }
 0x1bf   : > { %1912 = vmatprep.subr.bf16.mxu0 %v1911_v10 }
 0x1c2   : > { %1914 = vmatpush3.bf16.msra.mxu0 %v1911_v10 }
 0x1c3   : > { %1916 = vmatprep.subr.bf16.mxu0 %v1915_v13 }
 0x1c6   : > { %1918 = vmatpush3.bf16.msra.mxu0 %v1915_v13 }
 0x1c7   : > { %1920 = vmatprep.subr.bf16.mxu0 %v1919_v16 }
 0x1ca   : > { %1922 = vmatpush3.bf16.msra.mxu0 %v1919_v16 }
 0x1cb   : > { %1924 = vmatprep.subr.bf16.mxu0 %v1923_v19 }
 0x1ce   : > { %1926 = vmatpush3.bf16.msra.mxu0 %v1923_v19 }
 0x1d1   : > { %1808 = vmatmul.mubr.f32.vlgmr.msra.gmra.mrb[2].mxu0 %v899_v20 }
 0x284   : > { %v1739_v22 = vpop.f32.mrb[0].mxu0 }
 0x285   : > { %v1774_v23 = vpop.f32.mrb[0].mxu1  ;;  %v798_v24 = vpop.f32.mrb[1].mxu0 }
 0x286   : > { %v992_v25 = vsub.f32 %v1739_v22, %v1774_v23  ;;  %v889_v26 = vpop.f32.mrb[1].mxu1 }
 0x287   : > { %v991_v27 = vsub.f32 %v798_v24, %v889_v26 }
 0x289   : > { %v1927_v28 = vpack.c.bf16 %v992_v25, %v991_v27 }
 0x28b   : > { %1928 = vmatprep.subr.bf16.mxu1 %v1927_v28 }
 0x28c   : > { %1930 = vmatpush3.bf16.msra.mxu1 %v1927_v28 }
 0x28f   : > { %1815 = vmatmul.mubr.msk.f32.vlgmr.msra.gmra.mrb[2].mxu1 %vm999_vm0, %v998_v29 }
 0x290   : > { %1821 = vmatprep.mubr.msk.f32.mxu1 %vm999_vm0, %v1081_v30 }
 0x2a4   : > { %v1809_v31 = vpop.f32.mrb[2].mxu0 }
 0x2a5   : > { %v994_v32 = vsub.f32 %v1809_v31, %v1739_v22  ;;  %v982_v33 = vpop.f32.mrb[3].mxu0 }
 0x2a6   : > { %v993_v34 = vsub.f32 %v982_v33, %v798_v24 }
 0x2a7   : > { %v996_v35 = vsub.f32 %v994_v32, %v1774_v23 }
 0x2a8   : > { %v995_v36 = vsub.f32 %v993_v34, %v889_v26 }
 0x2a9   : > { %v1167_v37 = vadd.f32 %v996_v35, %v992_v25 }
 0x2aa   : > { %v1166_v38 = vadd.f32 %v995_v36, %v991_v27  ;;  %v1931_v39 = vpack.c.bf16 %v996_v35, %v995_v36 }
 0x2ac   : > { %1932 = vmatprep.subr.bf16.mxu1 %v1931_v39  ;;  %v1935_v40 = vpack.c.bf16 %v1167_v37, %v1166_v38 }
 0x2ad   : > { %1934 = vmatpush3.bf16.msra.mxu1 %v1931_v39 }
 0x2ae   : > { %1936 = vmatprep.subr.bf16.mxu1 %v1935_v40 }
 0x2b0   : > { %1822 = vmatmul.mubr.msk.f32.vlgmr.msra.gmra.mrb[4].mxu1 %vm999_vm0, %v1082_v41 }
 0x2b1   : > { %1938 = vmatpush3.bf16.msra.mxu1 %v1935_v40  ;;  %1828 = vmatprep.mubr.msk.f32.mxu1 %vm999_vm0, %v1164_v42 }
 0x2b4   : > { %1829 = vmatmul.mubr.msk.f32.vlgmr.msra.gmra.mrb[6].mxu1 %vm999_vm0, %v1165_v43 }
 0x362   : > { %v1816_v44 = vpop.f32.mrb[2].mxu1 }
 0x363   : > { %v1072_v45 = vpop.f32.mrb[3].mxu1 }
 0x383   : > { %v1823_v46 = vpop.f32.mrb[4].mxu1 }
 0x384   : > { %v1250_v47 = vsub.f32 %v1816_v44, %v1823_v46  ;;  %v1155_v48 = vpop.f32.mrb[5].mxu1 }
 0x385   : > { %v1249_v49 = vsub.f32 %v1072_v45, %v1155_v48 }
 0x386   : > { %v1262_v60 = vmul.f32 %v1256_v53, %v1250_v47  ;;  %v1276_v61 = vmul.f32 %v1258_v54, %v1250_v47 }
 0x387   : > { %v1830_v50 = vpop.f32.mrb[6].mxu1  ;;  %v1261_v0 = vmul.f32 %v1255_v56, %v1249_v49  ;;  %v1275_v1 = vmul.f32 %v1257_v57, %v1249_v49 }
 0x388   : > { %v1252_v51 = vsub.f32 %v1830_v50, %v1816_v44  ;;  %v1240_v52 = vpop.f32.mrb[7].mxu1 }
 0x389   : > { %v1251_v55 = vsub.f32 %v1240_v52, %v1072_v45 }
 0x38a   : > { %v1254_v58 = vsub.f32 %v1252_v51, %v1823_v46 }
 0x38b   : > { %v1253_v59 = vsub.f32 %v1251_v55, %v1155_v48 }
 0x38c   : > { %v1264_v62 = vmul.f32 %v1258_v54, %v1254_v58  ;;  %v1274_v63 = vmul.f32 %v1256_v53, %v1254_v58 }
 0x38d   : > { %v1263_v4 = vmul.f32 %v1257_v57, %v1253_v59  ;;  %v1273_v5 = vmul.f32 %v1255_v56, %v1253_v59 }
 0x38e   : > { %v1266_v6 = vadd.f32 %v1264_v62, %v1262_v60  ;;  %v1278_v7 = vsub.f32 %v1274_v63, %v1276_v61 }
 0x38f   : > { %v1265_v10 = vadd.f32 %v1263_v4, %v1261_v0  ;;  %v1277_v11 = vsub.f32 %v1273_v5, %v1275_v1 }
 0x390   : > { %v1268_v12 = vadd.f32 %v1266_v6, %v1260_v2  ;;  %v1280_v13 = vadd.f32 %v1278_v7, %v1272_v3 }
 0x391   : > { %v1267_v14 = vadd.f32 %v1265_v10, %v1259_v8  ;;  %v1279_v15 = vadd.f32 %v1277_v11, %v1271_v9 }
 0x392   : > { %1270 = vst [vmem:[%s3198_s3 + $0x8] sm:$0xff] %v1268_v12  ;;  %1282 = vst [vmem:[%s3201_s18 + $0x8] sm:$0xff] %v1280_v13 }
 0x393   : > { %1269 = vst [vmem:[%s3198_s3] sm:$0xff] %v1267_v14  ;;  %1281 = vst [vmem:[%s3201_s18] sm:$0xff] %v1279_v15 }
 0x394   : > { %2425 = shalt.err (!%p2422_p2)
}
 0x395   : > { %s2426_s3 = scalar_lea.hbm %s3249_s5, 256  ;;  %s2430_s9 = scalar_lea.hbm %s3486_s15, 512 }
 0x396   : > { %p2427_p4 = scmp.ne.s32.totalorder %s3249_s5, %s2426_s3  ;;  %p2431_p5 = scmp.lt.u32.totalorder %s3249_s5, %s3486_s15 }
 0x397   : > { %p2432_p7 = scmp.lt.u32.totalorder %s2430_s9, %s2426_s3  ;;  %p2434_p9 = scmp.lt.u32.totalorder %s2426_s3, %s3249_s5 }
 0x398   : > { %p2428_p1 = pnand %p2427_p4, %p3488_p13 }
 0x399   : > { %p2433_p11 = por %p2432_p7, %p2431_p5 }
 0x39a   : > { %p2429_p12 = pneg %p2428_p1 }
 0x39b   : > { %p2435_p6 = por %p2434_p9, %p2433_p11 }
 0x39d   : > { %p2436_p0 = pnand %p2435_p6, %p2429_p12 }
 0x39f   : > { %2439 = shalt.err (!%p2436_p0)
}
 0x3a0   : > { %s2606_s12 = smov 128   ;;  %s2607_s25 = smov 8  }
 0x3a1   : > { %1969 = dma.vmem_to_hbm [thread:$0]  (%p3488_p13), %s3252_s28, 256, %s3249_s5, %s1284_s11, %s2606_s12, %s2606_s12, %s2607_s25  }
 0x3a2   : > { %s1289_s29 = scalar_lea.sflag [#allocation21], %s3169_s24  ;;  %s2440_s30 = scalar_lea.vmem %s3261_s4, 256 }
 0x3a3   : > { %p2441_p3 = scmp.ne.s32.totalorder %s3261_s4, %s2440_s30  ;;  %s2608_s14 = smov [#allocation20]  }
 0x3a4   : > { %s2444_s27 = sshll.u32 %s2608_s14, 4  ;;  %s2445_s27 = int_to_ptr.vmem [resolvable:$false] %s2444_s27 }
 0x3a5   : > { %p2442_p8 = pnand %p2441_p3, %p3488_p13  ;;  %s2446_s7 = scalar_lea.vmem %s2445_s27, 512 }
 0x3a6   : > { %p2447_p2 = scmp.lt.s32.totalorder %s3261_s4, %s2445_s27  ;;  %p2448_p4 = scmp.lt.s32.totalorder %s2446_s7, %s2440_s30 }
 0x3a7   : > { %p2443_p10 = pneg %p2442_p8 }
 0x3a8   : > { %p2449_p1 = por %p2448_p4, %p2447_p2 }
 0x3aa   : > { %p2450_p12 = pnand %p2449_p1, %p2443_p10 }
 0x3ac   : > { %2453 = shalt.err (!%p2450_p12)
}
 0x3ad   : > { %s2454_s28 = scalar_lea.hbm %s3259_s20, 256  ;;  %s2458_s3 = scalar_lea.hbm %s3487_s6, 512 }
 0x3ae   : > { %p2455_p5 = scmp.ne.s32.totalorder %s3259_s20, %s2454_s28  ;;  %p2459_p9 = scmp.lt.u32.totalorder %s3259_s20, %s3487_s6 }
 0x3af   : > { %p2460_p6 = scmp.lt.u32.totalorder %s2458_s3, %s2454_s28  ;;  %p2462_p3 = scmp.lt.u32.totalorder %s2454_s28, %s3259_s20 }
 0x3b0   : > { %p2456_p7 = pnand %p2455_p5, %p3488_p13 }
 0x3b1   : > { %p2461_p0 = por %p2460_p6, %p2459_p9 }
 0x3b2   : > { %p2457_p11 = pneg %p2456_p7 }
 0x3b3   : > { %p2463_p8 = por %p2462_p3, %p2461_p0 }
 0x3b5   : > { %p2464_p10 = pnand %p2463_p8, %p2457_p11 }
 0x3b7   : > { %2467 = shalt.err (!%p2464_p10)
}
 0x3b8   : > { %1970 = dma.vmem_to_hbm [thread:$0]  (%p3488_p13), %s3261_s4, 256, %s3259_s20, %s1289_s29, %s2606_s12, %s2606_s12, %s2607_s25  }
 0x3b9 PF: > { %s3489_s9 = sld [smem:[#allocation31_spill]]  ;;  %p2023_p2 = scmp.ge.s32.totalorder %s2590_s13, 2 }
 0x3ba   : > { %p3490_p4 = scmp.ne.s32.totalorder %s3462_s19, 0 }
 0x3bc   : > { %p2006_p1 = pnand %p2023_p2, %p3490_p4 }
 0x3bf   : > { %s1333_s22 = sand.u32 1, %s3489_s9  }
 0x3c0   : > { %s1334_s21 = scalar_lea.sflag [#allocation4], %s1333_s22 }
 0x3c1   : > { %2541 = dma.done.wait (!%p2006_p1), %s1334_s21, 256  }
 0x3c2   : > { %2543 = vsyncadd (!%p2006_p1), %s1334_s21, 4294967040  ;;  %s1343_s17 = scalar_lea.sflag [#allocation21], %s1333_s22 }
 0x3c3   : > { %2545 = dma.done.wait (!%p2006_p1), %s1343_s17, 256  }
 0x3c4   : > { %2547 = vsyncadd (!%p2006_p1), %s1343_s17, 4294967040  ;;  %s41_s13 = sadd.s32 1, %s2590_s13   ;;  %s3491_s21 = sld [smem:[#allocation32_spill]] }
 0x3c5   : > { %p38_p12 = scmp.ge.s32.totalorder %s41_s13, 10   ;;  %s3492_s24 = sld [smem:[#allocation33_spill]] }
 0x3c6   : > { %s3493_s4 = sld [smem:[#allocation42_spill]]  ;;  %s3494_s27 = sld [smem:[#allocation36_spill]] }
 0x3c7   : > { %s3495_s28 = sld [smem:[#allocation37_spill]]  ;;  %s3496_s29 = sld [smem:[#allocation39_spill]] }
 0x3c8   : > { %s3497_s30 = sld [smem:[#allocation40_spill]]  ;;  %s3498_s22 = smov %s2558_s23 }
 0x3c9   : > { %s3499_s23 = smov %s3047_s1  ;;  %s3500_s25 = smov %s2570_s26 }
 0x3ca   :  { %40 = sbr.rel (!%p38_p12) target bundleno = 31 (0x1f), region = 198 }
 0x3cc   : > { %s3501_s26 = smov %s3493_s4 }
 0x3d1   :  { %1348 = vsyncpa [#allocation3], 1 }
 0x3d2   :  { %1350 = vsyncpa [#allocation3 + $0x1], 1 }
 0x3d3   :  { %1351 = vsyncpa [#allocation6], 1 }
 0x3d4   :  { %1353 = vsyncpa [#allocation6 + $0x1], 1 }
 0x3d5   :  { %1354 = vsyncpa [#allocation9], 1 }
 0x3d6   :  { %1356 = vsyncpa [#allocation9 + $0x1], 1 }
 0x3d7   :  { %1357 = vsyncpa [#allocation12], 1 }
 0x3d8   :  { %1358 = vsyncpa [#allocation15], 1 }
 0x3d9   :  { %1359 = vsyncpa [#allocation18], 1 }
 0x3da   :  { %1360 = vsyncpa [#allocation4], 1 }
 0x3db   :  { %1362 = vsyncpa [#allocation4 + $0x1], 1 }
 0x3dc   :  { %1363 = vsyncpa [#allocation21], 1 }
 0x3dd   :  { %1365 = vsyncpa [#allocation21 + $0x1], 1 }

// kernel: tpu_custom_call.1
= control target key start
LH: loop header
LB: loop body
LE: loop exit
PB: predicated region body
PF: predicated region fallthrough
CT: control target
= control target key end

     0   :  { %s3356_s0 = inlined_call_operand.hbm [shape: f32[2,4,16,128], index: 0, kind: input, shape index: {}]   ;;  %s3357_s1 = inlined_call_operand.hbm [shape: f32[2,4,16,128], index: 1, kind: input, shape index: {}]   ;;  %s3358_s2 = inlined_call_operand.hbm [shape: f32[2,16,128], index: 2, kind: input, shape index: {}]   ;;  %s3359_s3 = inlined_call_operand.hbm [shape: f32[2,4,16,128], index: 3, kind: input, shape index: {}]   ;;  %s3360_s4 = inlined_call_operand.hbm [shape: f32[2,4,16,128], index: 4, kind: input, shape index: {}]   ;;  %s3361_s5 = inlined_call_operand.vmem [shape: f32[16,16], index: 5, kind: input, shape index: {}]   ;;  %s3362_s6 = inlined_call_operand.hbm [shape: f32[16,16], index: 6, kind: input, shape index: {}]   ;;  %s3363_s7 = inlined_call_operand.hbm [shape: f32[16,16], index: 7, kind: input, shape index: {}]   ;;  %s3364_s8 = inlined_call_operand.hbm [shape: f32[128,128], index: 8, kind: input, shape index: {}]   ;;  %s3365_s9 = inlined_call_operand.hbm [shape: f32[128,128], index: 9, kind: input, shape index: {}]   ;;  %s3366_s10 = inlined_call_operand.hbm [shape: f32[128,128], index: 10, kind: input, shape index: {}]   ;;  %s3367_s11 = inlined_call_operand.hbm [shape: f32[2,16,128], index: 11, kind: output, shape index: {0}]   ;;  %s3368_s12 = inlined_call_operand.hbm [shape: f32[2,16,128], index: 12, kind: output, shape index: {1}]  }
   0x1   :  { %3405 = sst [smem:[#allocation44_spill]] %s3356_s0 }
   0x2   :  { %3406 = sst [smem:[#allocation45_spill]] %s3357_s1 }
   0x3   :  { %3407 = sst [smem:[#allocation46_spill]] %s3358_s2 }
   0x4   :  { %3408 = sst [smem:[#allocation47_spill]] %s3359_s3 }
   0x5   :  { %3409 = sst [smem:[#allocation48_spill]] %s3360_s4 }
   0x6   :  { %3410 = sst [smem:[#allocation49_spill]] %s3361_s5 }
   0x7   :  { %3411 = sst [smem:[#allocation50_spill]] %s3362_s6 }
   0x8   :  { %3412 = sst [smem:[#allocation51_spill]] %s3363_s7 }
   0x9   :  { %3413 = sst [smem:[#allocation52_spill]] %s3364_s8 }
   0xa   :  { %3414 = sst [smem:[#allocation53_spill]] %s3365_s9 }
   0xb   :  { %3415 = sst [smem:[#allocation54_spill]] %s3367_s11 }
   0xc   :  { %3416 = sst [smem:[#allocation55_spill]] %s3368_s12 }
   0xd   :  { %18 = vsyncpa [#allocation3], 0 }
   0xe   :  { %20 = vsyncpa [#allocation3 + $0x1], 0 }
   0xf   :  { %21 = vsyncpa [#allocation6], 0 }
  0x10   :  { %23 = vsyncpa [#allocation6 + $0x1], 0 }
  0x11   :  { %24 = vsyncpa [#allocation9], 0 }
  0x12   :  { %26 = vsyncpa [#allocation9 + $0x1], 0 }
  0x13   :  { %27 = vsyncpa [#allocation12], 0 }
  0x14   :  { %28 = vsyncpa [#allocation15], 0 }
  0x15   :  { %29 = vsyncpa [#allocation18], 0 }
  0x16   :  { %30 = vsyncpa [#allocation4], 0 }
  0x17   :  { %32 = vsyncpa [#allocation4 + $0x1], 0 }
  0x18   :  { %33 = vsyncpa [#allocation21], 0 }
  0x19   :  { %35 = vsyncpa [#allocation21 + $0x1], 0  ;;  %s2674_s21 = smov 0   ;;  %s2676_s22 = smov 0  }
  0x1a   :  { %s2678_s23 = smov 0   ;;  %s2680_s24 = smov 0  }
  0x1b   :  { %s2682_s25 = smov 0   ;;  %s2684_s26 = smov 0  }
  0x1c   :  { %s2686_s27 = smov 0   ;;  %s2688_s28 = smov 0  }
  0x1d   :  { %s2690_s29 = smov 0   ;;  %s2692_s30 = smov 0  }
  0x1e   :  { %s2694_s13 = smov 0  }
  0x1f LB: > { %3417 = sst [smem:[#allocation31_spill]] %s2550_s21  ;;  %s2730_s14 = sadd.s32 4294967295, %s2590_s13   ;;  %s2590_s13 = sphi %s2694_s13, %s41_s13   ;;  %s2586_s30 = sphi %s2692_s30, %s3497_s30   ;;  %s2582_s29 = sphi %s2690_s29, %s3496_s29   ;;  %s2578_s28 = sphi %s2688_s28, %s3495_s28   ;;  %s2574_s27 = sphi %s2686_s27, %s3494_s27   ;;  %s2570_s26 = sphi %s2684_s26, %s3501_s26   ;;  %s2566_s25 = sphi %s2682_s25, %s3500_s25   ;;  %s2562_s24 = sphi %s2680_s24, %s3492_s24   ;;  %s2558_s23 = sphi %s2678_s23, %s3499_s23   ;;  %s2554_s22 = sphi %s2676_s22, %s3498_s22   ;;  %s2550_s21 = sphi %s2674_s21, %s3491_s21  }
  0x20   : > { %3418 = sst [smem:[#allocation32_spill]] %s2554_s22  ;;  %p1582_p0 = scmp.ge.s32.totalorder %s2590_s13, 1 }
  0x21   : > { %3419 = sst [smem:[#allocation33_spill]] %s2566_s25  ;;  %p3373_p1 = scmp.eq.s32.totalorder %s2730_s14, 0 }
  0x22   : > { %3420 = sst [smem:[#allocation34_spill]] %s2574_s27  ;;  %p374_p2 = scmp.lt.s32.totalorder %s2590_s13, 9 }
  0x23   : > { %3421 = sst [smem:[#allocation35_spill]] %s2578_s28  ;;  %s2592_s16 = smov [#allocation11]  }
  0x24   : > { %3422 = sst [smem:[#allocation36_spill]] %s2582_s29  ;;  %p2735_p3 = pnand %p1582_p0, %p374_p2 }
  0x25   : > { %3423 = sst [smem:[#allocation37_spill]] %s2586_s30  ;;  %s389_s17 = sshll.u32 %s2592_s16, 4  ;;  %s390_s17 = int_to_ptr.vmem [resolvable:$true] %s389_s17 }
  0x26   : > { %s3424_s15 = scalar_select %p2735_p3, 1, 0 }
  0x27   : > { %p1973_p4 = pneg %p2735_p3  ;;  %s2593_s19 = smov [#allocation14]  }
  0x28   : > { %3425 = sst [smem:[#allocation38_spill]] %s3424_s15  ;;  %s415_s20 = sshll.u32 %s2593_s19, 4  ;;  %s2747_s20 = int_to_ptr.vmem [resolvable:$true] %s415_s20 }
  0x29   : > { %p2743_p5 = pnand %p1973_p4, %p3373_p1  ;;  %s3427_s6 = sld [smem:[#allocation50_spill]] }
  0x2b   : > { %s3426_s18 = scalar_select %p2743_p5, 1, 0 }
  0x2c   : > { %p2757_p7 = pneg %p2743_p5 }
  0x2e   : > { %s3428_s16 = scalar_select %p2757_p7, 1, 0 }
  0x2f   : > { %s2122_s28 = scalar_lea.hbm %s3427_s6, 256 }
  0x30   : > { %p2123_p6 = scmp.ne.s32.totalorder %s3427_s6, %s2122_s28  ;;  %p2129_p10 = scmp.lt.u32.totalorder %s2122_s28, %s3427_s6 }
  0x32   : > { %p2125_p8 = pnand %p2757_p7, %p2123_p6 }
  0x34   : > { %p2126_p9 = pneg %p2125_p8 }
  0x36   : > { %p2131_p11 = pnand %p2129_p10, %p2126_p9 }
  0x38   : > { %2134 = shalt.err (!%p2131_p11)
}
  0x39   : > { %s2135_s11 = scalar_lea.vmem %s390_s17, 256  ;;  %p2143_p2 = scmp.lt.s32.totalorder %s390_s17, %s390_s17 }
  0x3a   : > { %p2136_p12 = scmp.ne.s32.totalorder %s390_s17, %s2135_s11  ;;  %p2144_p4 = scmp.lt.s32.totalorder %s2135_s11, %s2135_s11 }
  0x3c   : > { %p2138_p13 = pnand %p2136_p12, %p2757_p7  ;;  %p2145_p1 = por %p2144_p4, %p2143_p2 }
  0x3e   : > { %p2139_p0 = pneg %p2138_p13 }
  0x40   : > { %p2146_p3 = pnand %p2145_p1, %p2139_p0 }
  0x42   : > { %2149 = shalt.err (!%p2146_p3)
}
  0x43   : > { %s3378_s5 = smov 128   ;;  %s3380_s12 = smov 8  }
  0x44   : > { %1976 = dma.hbm_to_vmem [thread:$0]  (!%p2743_p5), %s3427_s6, 256, %s390_s17, [#allocation12], %s3378_s5, %s3378_s5, %s3380_s12  }
  0x45   : > { %s3429_s8 = sld [smem:[#allocation52_spill]] }
  0x4b   : > { %s2150_s4 = scalar_lea.hbm %s3429_s8, 2048 }
  0x4c   : > { %p2151_p1 = scmp.ne.s32.totalorder %s3429_s8, %s2150_s4  ;;  %p2157_p8 = scmp.lt.u32.totalorder %s2150_s4, %s3429_s8 }
  0x4e   : > { %p2153_p3 = pnand %p2151_p1, %p2757_p7 }
  0x50   : > { %p2154_p6 = pneg %p2153_p3 }
  0x52   : > { %p2159_p9 = pnand %p2157_p8, %p2154_p6 }
  0x54   : > { %2162 = shalt.err (!%p2159_p9)
}
  0x55   : > { %s2163_s17 = scalar_lea.vmem %s2747_s20, 2048  ;;  %p2171_p13 = scmp.lt.s32.totalorder %s2747_s20, %s2747_s20 }
  0x56   : > { %p2164_p10 = scmp.ne.s32.totalorder %s2747_s20, %s2163_s17  ;;  %p2172_p0 = scmp.lt.s32.totalorder %s2163_s17, %s2163_s17 }
  0x58   : > { %p2166_p11 = pnand %p2164_p10, %p2757_p7  ;;  %p2173_p2 = por %p2172_p0, %p2171_p13 }
  0x5a   : > { %p2167_p12 = pneg %p2166_p11 }
  0x5c   : > { %p2174_p4 = pnand %p2173_p2, %p2167_p12 }
  0x5e   : > { %2177 = shalt.err (!%p2174_p4)
}
  0x5f   : > { %1982 = dma.hbm_to_vmem [thread:$0]  (!%p2743_p5), %s3429_s8, 2048, %s2747_s20, [#allocation15], %s3378_s5, %s3378_s5, %s3380_s12  }
  0x60   : > { %s50_s21 = sadd.s32 1, %s2582_s29  ;;  %s53_s22 = sadd.s32 1, %s2586_s30 }
  0x61   : > { %p51_p1 = scmp.ge.s32.totalorder %s50_s21, 4  ;;  %s62_s27 = sadd.s32 1, %s2570_s26 }
  0x62   : > { %p69_p3 = scmp.ne.s32.totalorder %s2570_s26, %s2566_s25  ;;  %p3387_p6 = scmp.eq.s32.totalorder %s2590_s13, 0 }
  0x63   : > { %s3503_s21 = smov (%p51_p1, %s50_s21), 0  ;;  %s3505_s22 = smov (!%p51_p1, %s53_s22), %s2586_s30 }
  0x64   : > { %3430 = sst [smem:[#allocation39_spill]] %s3503_s21  ;;  %s58_s28 = ssub.s32 %s2582_s29, %s3503_s21 }
  0x65   : > { %p2815_p8 = por %p3387_p6, %p69_p3  ;;  %p55_p9 = scmp.ge.s32.totalorder %s3505_s22, 2 }
  0x66   : > { %p75_p10 = scmp.ne.s32.totalorder %s2566_s25, %s2562_s24  ;;  %p3386_p11 = scmp.lt.s32.totalorder %s2590_s13, 8 }
  0x67   : > { %s3382_s15 = sand.u32 1, %s2570_s26   ;;  %s3507_s22 = smov (%p55_p9, %s3505_s22), 0 }
  0x68   : > { %3432 = sst [smem:[#allocation40_spill]] %s3507_s22  ;;  %p3433_p12 = scmp.eq.s32.totalorder %s2730_s14, 0 }
  0x69   : > { %s2833_s11 = sshll.u32 %s3382_s15, 4  ;;  %s2837_s17 = ssub.s32 %s2586_s30, %s3507_s22 }
  0x6a   : > { %p2827_p13 = por %p3433_p12, %p75_p10  ;;  %s1590_s24 = sshll.u32 %s2582_s29, 1 }
  0x6b   : > { %s59_s2 = sor.u32 %s58_s28, %s2837_s17  ;;  %s1591_s4 = sshll.u32 %s2586_s30, 3 }
  0x6c   : > { %s3434_s19 = scalar_select %p2827_p13, 1, 0 }
  0x6d   : > { %p60_p2 = scmp.eq.s32.totalorder %s59_s2, 0  ;;  %s465_s5 = sadd.s32 %s1591_s4, %s1590_s24 }
  0x6e   : > { %3435 = sst [smem:[#allocation41_spill]] %s3434_s19  ;;  %p2847_p4 = pnand %p3386_p11, %p2815_p8 }
  0x6f   : > { %s2852_s15 = scalar_select %p60_p2, %s2570_s26, %s62_s27  }
  0x70   : > { %s3436_s12 = scalar_select %p2847_p4, 1, 0 }
  0x71   : > { %3437 = sst [smem:[#allocation42_spill]] %s2852_s15  ;;  %s2854_s6 = sshll.u32 %s465_s5, 7 }
  0x72   : > { %s3388_s8 = sand.u32 1, %s2590_s13   ;;  %s3438_s1 = sld [smem:[#allocation45_spill]] }
  0x73   : > { %s482_s20 = scalar_lea.vmem [#allocation5], %s2833_s11  ;;  %s2868_s27 = scalar_lea.sflag [#allocation6], %s3388_s8 }
  0x74   : > { %s491_s24 = sshll.u32 %s482_s20, 4  ;;  %3439 = sst [smem:[#allocation43_spill]] %s2868_s27  ;;  %s2864_s24 = int_to_ptr.vmem [resolvable:$true] %s491_s24 }
  0x75   : > { %p2874_p3 = pneg %p2847_p4 }
  0x77   : > { %s3440_s2 = scalar_select %p2874_p3, 1, 0 }
  0x78   : > { %s2861_s28 = scalar_lea.hbm %s3438_s1, %s2854_s6  ;;  %s2183_s4 = scalar_lea.hbm %s3438_s1, 2048 }
  0x79   : > { %s2178_s5 = scalar_lea.hbm %s2861_s28, 256  ;;  %p2184_p10 = scmp.lt.u32.totalorder %s2861_s28, %s3438_s1 }
  0x7a   : > { %p2179_p1 = scmp.ne.s32.totalorder %s2861_s28, %s2178_s5  ;;  %p2185_p12 = scmp.lt.u32.totalorder %s2183_s4, %s2178_s5 }
  0x7b   : > { %p2187_p11 = scmp.lt.u32.totalorder %s2178_s5, %s2861_s28 }
  0x7c   : > { %p2181_p8 = pnand %p2874_p3, %p2179_p1  ;;  %p2186_p2 = por %p2185_p12, %p2184_p10 }
  0x7e   : > { %p2182_p9 = pneg %p2181_p8  ;;  %p2188_p6 = por %p2187_p11, %p2186_p2 }
  0x80   : > { %p2189_p0 = pnand %p2188_p6, %p2182_p9 }
  0x82   : > { %2192 = shalt.err (!%p2189_p0)
}
  0x83   : > { %s2193_s8 = scalar_lea.vmem %s2864_s24, 256  ;;  %s2596_s21 = smov [#allocation5]  }
  0x84   : > { %p2194_p1 = scmp.ne.s32.totalorder %s2864_s24, %s2193_s8  ;;  %s2198_s22 = sshll.u32 %s2596_s21, 4  ;;  %s2199_s22 = int_to_ptr.vmem [resolvable:$false] %s2198_s22 }
  0x85   : > { %s2200_s29 = scalar_lea.vmem %s2199_s22, 512  ;;  %p2201_p5 = scmp.lt.s32.totalorder %s2864_s24, %s2199_s22 }
  0x86   : > { %p2196_p8 = pnand %p2194_p1, %p2874_p3  ;;  %p2202_p7 = scmp.lt.s32.totalorder %s2200_s29, %s2193_s8 }
  0x88   : > { %p2197_p13 = pneg %p2196_p8  ;;  %p2203_p10 = por %p2202_p7, %p2201_p5 }
  0x8a   : > { %p2204_p12 = pnand %p2203_p10, %p2197_p13 }
  0x8c   : > { %2207 = shalt.err (!%p2204_p12)
}
  0x8d   : > { %s3441_s5 = smov 8   ;;  %s3442_s4 = smov 128  }
  0x8e   : > { %1995 = dma.hbm_to_vmem [thread:$0]  (!%p2847_p4), %s2861_s28, 256, %s2864_s24, %s2868_s27, %s3442_s4, %s3442_s4, %s3441_s5  }
  0x8f   : > { %s3443_s3 = sld [smem:[#allocation47_spill]]  ;;  %s526_s22 = scalar_lea.vmem [#allocation8], %s2833_s11 }
  0x90   : > { %s535_s29 = sshll.u32 %s526_s22, 4  ;;  %s3444_s1 = sand.u32 1, %s2590_s13   ;;  %s2908_s29 = int_to_ptr.vmem [resolvable:$true] %s535_s29 }
  0x91   : > { %s2912_s15 = scalar_lea.sflag [#allocation9], %s3444_s1 }
  0x95   : > { %s2905_s8 = scalar_lea.hbm %s3443_s3, %s2854_s6  ;;  %s2213_s20 = scalar_lea.hbm %s3443_s3, 2048 }
  0x96   : > { %s2208_s19 = scalar_lea.hbm %s2905_s8, 256  ;;  %p2214_p11 = scmp.lt.u32.totalorder %s2905_s8, %s3443_s3 }
  0x97   : > { %p2209_p5 = scmp.ne.s32.totalorder %s2905_s8, %s2208_s19  ;;  %p2215_p13 = scmp.lt.u32.totalorder %s2213_s20, %s2208_s19 }
  0x98   : > { %p2217_p9 = scmp.lt.u32.totalorder %s2208_s19, %s2905_s8 }
  0x99   : > { %p2211_p7 = pnand %p2209_p5, %p2874_p3  ;;  %p2216_p0 = por %p2215_p13, %p2214_p11 }
  0x9b   : > { %p2212_p6 = pneg %p2211_p7  ;;  %p2218_p2 = por %p2217_p9, %p2216_p0 }
  0x9d   : > { %p2219_p1 = pnand %p2218_p2, %p2212_p6 }
  0x9f   : > { %2222 = shalt.err (!%p2219_p1)
}
  0xa0   : > { %s2223_s1 = scalar_lea.vmem %s2908_s29, 256  ;;  %s2597_s22 = smov [#allocation8]  }
  0xa1   : > { %p2224_p8 = scmp.ne.s32.totalorder %s2908_s29, %s2223_s1  ;;  %s2228_s28 = sshll.u32 %s2597_s22, 4  ;;  %s2229_s28 = int_to_ptr.vmem [resolvable:$false] %s2228_s28 }
  0xa2   : > { %s2230_s25 = scalar_lea.vmem %s2229_s28, 512  ;;  %p2231_p5 = scmp.lt.s32.totalorder %s2908_s29, %s2229_s28 }
  0xa3   : > { %p2226_p10 = pnand %p2224_p8, %p2874_p3  ;;  %p2232_p7 = scmp.lt.s32.totalorder %s2230_s25, %s2223_s1 }
  0xa5   : > { %p2227_p12 = pneg %p2226_p10  ;;  %p2233_p11 = por %p2232_p7, %p2231_p5 }
  0xa7   : > { %p2234_p13 = pnand %p2233_p11, %p2227_p12 }
  0xa9   : > { %2237 = shalt.err (!%p2234_p13)
}
  0xaa   : > { %2001 = dma.hbm_to_vmem [thread:$0]  (!%p2847_p4), %s2905_s8, 256, %s2908_s29, %s2912_s15, %s3442_s4, %s3442_s4, %s3441_s5  }
  0xab   : > { %s2598_s19 = smov [#allocation13]   ;;  %s2599_s20 = smov [#allocation16]  }
  0xac   : > { %s402_s24 = sshll.u32 %s2598_s19, 4  ;;  %s428_s21 = sshll.u32 %s2599_s20, 4  ;;  %s403_s24 = int_to_ptr.vmem [resolvable:$true] %s402_s24  ;;  %s429_s21 = int_to_ptr.vmem [resolvable:$true] %s428_s21 }
  0xad   : > { %s3445_s7 = sld [smem:[#allocation51_spill]]  ;;  %p3446_p0 = scmp.ne.s32.totalorder %s3428_s16, 0 }
  0xb3   : > { %s2238_s28 = scalar_lea.hbm %s3445_s7, 256 }
  0xb4   : > { %p2239_p6 = scmp.ne.s32.totalorder %s3445_s7, %s2238_s28  ;;  %p2245_p1 = scmp.lt.u32.totalorder %s2238_s28, %s3445_s7 }
  0xb6   : > { %p2241_p9 = pnand %p2239_p6, %p3446_p0 }
  0xb8   : > { %p2242_p2 = pneg %p2241_p9 }
  0xba   : > { %p2247_p8 = pnand %p2245_p1, %p2242_p2 }
  0xbc   : > { %2250 = shalt.err (!%p2247_p8)
}
  0xbd   : > { %s2251_s8 = scalar_lea.vmem %s403_s24, 256  ;;  %p2259_p7 = scmp.lt.s32.totalorder %s403_s24, %s403_s24 }
  0xbe   : > { %p2252_p10 = scmp.ne.s32.totalorder %s403_s24, %s2251_s8  ;;  %p2260_p11 = scmp.lt.s32.totalorder %s2251_s8, %s2251_s8 }
  0xc0   : > { %p2254_p12 = pnand %p2252_p10, %p3446_p0  ;;  %p2261_p13 = por %p2260_p11, %p2259_p7 }
  0xc2   : > { %p2255_p5 = pneg %p2254_p12 }
  0xc4   : > { %p2262_p4 = pnand %p2261_p13, %p2255_p5 }
  0xc6   : > { %2265 = shalt.err (!%p2262_p4)
}
  0xc7   : > { %p3447_p6 = scmp.ne.s32.totalorder %s3426_s18, 0  ;;  %s3448_s9 = sld [smem:[#allocation53_spill]] }
  0xc9   : > { %1979 = dma.hbm_to_vmem [thread:$0]  (!%p3447_p6), %s3445_s7, 256, %s403_s24, [#allocation12], %s3442_s4, %s3442_s4, %s3441_s5  }
  0xcd   : > { %s2266_s19 = scalar_lea.hbm %s3448_s9, 2048 }
  0xce   : > { %p2267_p9 = scmp.ne.s32.totalorder %s3448_s9, %s2266_s19  ;;  %p2273_p1 = scmp.lt.u32.totalorder %s2266_s19, %s3448_s9 }
  0xd0   : > { %p2269_p4 = pnand %p2267_p9, %p3446_p0 }
  0xd2   : > { %p2270_p2 = pneg %p2269_p4 }
  0xd4   : > { %p2275_p8 = pnand %p2273_p1, %p2270_p2 }
  0xd6   : > { %2278 = shalt.err (!%p2275_p8)
}
  0xd7   : > { %s2279_s25 = scalar_lea.vmem %s429_s21, 2048  ;;  %p2287_p7 = scmp.lt.s32.totalorder %s429_s21, %s429_s21 }
  0xd8   : > { %p2280_p10 = scmp.ne.s32.totalorder %s429_s21, %s2279_s25  ;;  %p2288_p11 = scmp.lt.s32.totalorder %s2279_s25, %s2279_s25 }
  0xda   : > { %p2282_p12 = pnand %p2280_p10, %p3446_p0  ;;  %p2289_p13 = por %p2288_p11, %p2287_p7 }
  0xdc   : > { %p2283_p5 = pneg %p2282_p12 }
  0xde   : > { %p2290_p3 = pnand %p2289_p13, %p2283_p5 }
  0xe0   : > { %2293 = shalt.err (!%p2290_p3)
}
  0xe1   : > { %1985 = dma.hbm_to_vmem [thread:$0]  (!%p3447_p6), %s3448_s9, 2048, %s429_s21, [#allocation15], %s3442_s4, %s3442_s4, %s3441_s5  }
  0xe2   : > { %s2600_s3 = smov [#allocation17]   ;;  %s2294_s19 = scalar_lea.hbm %s3366_s10, 2048 }
  0xe3   : > { %s441_s30 = sshll.u32 %s2600_s3, 4  ;;  %p2295_p3 = scmp.ne.s32.totalorder %s3366_s10, %s2294_s19  ;;  %s442_s30 = int_to_ptr.vmem [resolvable:$true] %s441_s30 }
  0xe4   : > { %p2301_p2 = scmp.lt.u32.totalorder %s2294_s19, %s3366_s10 }
  0xe5   : > { %p2297_p9 = pnand %p2295_p3, %p3446_p0 }
  0xe7   : > { %p2298_p4 = pneg %p2297_p9 }
  0xe9   : > { %p2303_p1 = pnand %p2301_p2, %p2298_p4 }
  0xeb   : > { %2306 = shalt.err (!%p2303_p1)
}
  0xec   : > { %s2307_s21 = scalar_lea.vmem %s442_s30, 2048  ;;  %p2315_p5 = scmp.lt.s32.totalorder %s442_s30, %s442_s30 }
  0xed   : > { %p2308_p8 = scmp.ne.s32.totalorder %s442_s30, %s2307_s21  ;;  %p2316_p7 = scmp.lt.s32.totalorder %s2307_s21, %s2307_s21 }
  0xef   : > { %p2310_p10 = pnand %p2308_p8, %p3446_p0  ;;  %p2317_p11 = por %p2316_p7, %p2315_p5 }
  0xf1   : > { %p2311_p12 = pneg %p2310_p10 }
  0xf3   : > { %p2318_p13 = pnand %p2317_p11, %p2311_p12 }
  0xf5   : > { %2321 = shalt.err (!%p2318_p13)
}
  0xf6   : > { %1988 = dma.hbm_to_vmem [thread:$0]  (!%p3447_p6), %s3366_s10, 2048, %s442_s30, [#allocation18], %s3442_s4, %s3442_s4, %s3441_s5  }
  0xf7   : > { %s3449_s0 = sld [smem:[#allocation44_spill]]  ;;  %s459_s18 = scalar_lea.vmem [#allocation2], %s2833_s11 }
  0xf8   : > { %s468_s27 = sshll.u32 %s459_s18, 4  ;;  %s3450_s29 = sand.u32 1, %s2570_s26   ;;  %s3009_s27 = int_to_ptr.vmem [resolvable:$true] %s468_s27 }
  0xf9   : > { %s3013_s19 = scalar_lea.sflag [#allocation3], %s3450_s29  ;;  %p3451_p3 = scmp.ne.s32.totalorder %s3440_s2, 0 }
  0xfd   : > { %s3006_s3 = scalar_lea.hbm %s3449_s0, %s2854_s6  ;;  %s2327_s1 = scalar_lea.hbm %s3449_s0, 2048 }
  0xfe   : > { %s2322_s20 = scalar_lea.hbm %s3006_s3, 256  ;;  %p2328_p4 = scmp.lt.u32.totalorder %s3006_s3, %s3449_s0 }
  0xff   : > { %p2323_p0 = scmp.ne.s32.totalorder %s3006_s3, %s2322_s20  ;;  %p2329_p2 = scmp.lt.u32.totalorder %s2327_s1, %s2322_s20 }
 0x100   : > { %p2331_p8 = scmp.lt.u32.totalorder %s2322_s20, %s3006_s3 }
 0x101   : > { %p2325_p6 = pnand %p2323_p0, %p3451_p3  ;;  %p2330_p1 = por %p2329_p2, %p2328_p4 }
 0x103   : > { %p2326_p9 = pneg %p2325_p6  ;;  %p2332_p10 = por %p2331_p8, %p2330_p1 }
 0x105   : > { %p2333_p12 = pnand %p2332_p10, %p2326_p9 }
 0x107   : > { %2336 = shalt.err (!%p2333_p12)
}
 0x108   : > { %s2337_s25 = scalar_lea.vmem %s3009_s27, 256  ;;  %s2601_s24 = smov [#allocation2]  }
 0x109   : > { %p2338_p5 = scmp.ne.s32.totalorder %s3009_s27, %s2337_s25  ;;  %s2342_s16 = sshll.u32 %s2601_s24, 4  ;;  %s2343_s16 = int_to_ptr.vmem [resolvable:$false] %s2342_s16 }
 0x10a   : > { %s2344_s8 = scalar_lea.vmem %s2343_s16, 512  ;;  %p2345_p13 = scmp.lt.s32.totalorder %s3009_s27, %s2343_s16 }
 0x10b   : > { %p2340_p7 = pnand %p2338_p5, %p3451_p3  ;;  %p2346_p0 = scmp.lt.s32.totalorder %s2344_s8, %s2337_s25 }
 0x10d   : > { %p2341_p11 = pneg %p2340_p7  ;;  %p2347_p6 = por %p2346_p0, %p2345_p13 }
 0x10f   : > { %p2348_p4 = pnand %p2347_p6, %p2341_p11 }
 0x111   : > { %2351 = shalt.err (!%p2348_p4)
}
 0x112   : > { %p3452_p9 = scmp.ne.s32.totalorder %s3436_s12, 0  ;;  %s3453_s18 = sld [smem:[#allocation32_spill]] }
 0x113   : > { %s3454_s29 = sld [smem:[#allocation31_spill]]  ;;  %s3455_s20 = sld [smem:[#allocation37_spill]] }
 0x114   : > { %1992 = dma.hbm_to_vmem [thread:$0]  (!%p3452_p9), %s3006_s3, 256, %s3009_s27, %s3013_s19, %s3442_s4, %s3442_s4, %s3441_s5  }
 0x115   : > { %s1581_s30 = sadd.s32 4294967294, %s2590_s13   ;;  %s116_s22 = sadd.s32 1, %s2558_s23 }
 0x116   : > { %p3456_p1 = scmp.eq.s32.totalorder %s2837_s17, 0  ;;  %p3457_p8 = scmp.eq.s32.totalorder %s2590_s13, 0 }
 0x117   : > { %p335_p5 = scmp.eq.s32.totalorder %s2730_s14, 7  ;;  %p341_p7 = scmp.eq.s32.totalorder %s1581_s30, 7 }
 0x118   : > { %p123_p2 = scmp.ne.s32.totalorder %s2558_s23, %s3453_s18  ;;  %p3459_p11 = scmp.eq.s32.totalorder %s2730_s14, 0 }
 0x119   : > { %s3047_s1 = scalar_select %p3456_p1, %s2558_s23, %s116_s22  }
 0x11a   : > { %p3051_p10 = por %p123_p2, %p3457_p8  ;;  %p129_p12 = scmp.ne.s32.totalorder %s3453_s18, %s3454_s29 }
 0x11b   : > { %s503_s27 = sand.u32 1, %s2558_s23   ;;  %p3065_p0 = por %p335_p5, %p123_p2 }
 0x11c   : > { %p3060_p13 = por %p129_p12, %p3459_p11  ;;  %p3069_p6 = por %p341_p7, %p129_p12 }
 0x11d   : > { %s3461_s17 = scalar_select %p3065_p0, 1, 0 }
 0x11e   : > { %s3460_s3 = scalar_select %p3060_p13, 1, 0 }
 0x11f   : > { %s3462_s19 = scalar_select %p3069_p6, 1, 0 }
 0x120   : > { %s1597_s21 = sshll.u32 %s503_s27, 4  ;;  %s1636_s25 = sshll.u32 %s3455_s20, 8 }
 0x121   : > { %s3463_s8 = sld [smem:[#allocation46_spill]]  ;;  %s505_s29 = scalar_lea.vmem [#allocation7], %s1597_s21 }
 0x122   : > { %s512_s30 = sshll.u32 %s505_s29, 4  ;;  %p3464_p4 = scmp.lt.s32.totalorder %s2590_s13, 8  ;;  %s3087_s30 = int_to_ptr.vmem [resolvable:$true] %s512_s30 }
 0x124   : > { %p3083_p2 = pnand %p3464_p4, %p3051_p10 }
 0x126   : > { %p2354_p8 = pneg %p3083_p2 }
 0x127   : > { %s3077_s18 = scalar_lea.hbm %s3463_s8, %s1636_s25  ;;  %s3466_s25 = sld [smem:[#allocation48_spill]] }
 0x128   : > { %s2352_s0 = scalar_lea.hbm %s3077_s18, 256  ;;  %s2357_s29 = scalar_lea.hbm %s3463_s8, 512 }
 0x129   : > { %p2353_p1 = scmp.ne.s32.totalorder %s3077_s18, %s2352_s0  ;;  %p2358_p5 = scmp.lt.u32.totalorder %s3077_s18, %s3463_s8 }
 0x12a   : > { %p2359_p7 = scmp.lt.u32.totalorder %s2357_s29, %s2352_s0  ;;  %p2361_p4 = scmp.lt.u32.totalorder %s2352_s0, %s3077_s18 }
 0x12b   : > { %p2355_p12 = pnand %p2354_p8, %p2353_p1 }
 0x12c   : > { %p2360_p11 = por %p2359_p7, %p2358_p5 }
 0x12d   : > { %s3467_s16 = smov %s3466_s25  ;;  %s3093_s24 = scalar_lea.hbm %s3466_s25, %s2854_s6 }
 0x12e   : > { %p2356_p10 = pneg %p2355_p12  ;;  %p2362_p6 = por %p2361_p4, %p2360_p11 }
 0x130   : > { %p2363_p0 = pnand %p2362_p6, %p2356_p10 }
 0x132   : > { %2366 = shalt.err (!%p2363_p0)
}
 0x133   : > { %s2367_s6 = scalar_lea.vmem %s3087_s30, 256  ;;  %s2602_s20 = smov [#allocation7]  }
 0x134   : > { %p2368_p1 = scmp.ne.s32.totalorder %s3087_s30, %s2367_s6  ;;  %s2372_s27 = sshll.u32 %s2602_s20, 4  ;;  %s2373_s27 = int_to_ptr.vmem [resolvable:$false] %s2372_s27 }
 0x135   : > { %s2374_s7 = scalar_lea.vmem %s2373_s27, 512  ;;  %p2375_p9 = scmp.lt.s32.totalorder %s3087_s30, %s2373_s27 }
 0x136   : > { %p2370_p12 = pnand %p2368_p1, %p2354_p8  ;;  %p2376_p5 = scmp.lt.s32.totalorder %s2374_s7, %s2367_s6 }
 0x138   : > { %p2371_p13 = pneg %p2370_p12  ;;  %p2377_p7 = por %p2376_p5, %p2375_p9 }
 0x13a   : > { %p2378_p11 = pnand %p2377_p7, %p2371_p13 }
 0x13c   : > { %2381 = shalt.err (!%p2378_p11)
}
 0x13d   : > { %s3468_s0 = sld [smem:[#allocation43_spill]]  ;;  %s549_s9 = scalar_lea.vmem [#allocation10], %s2833_s11 }
 0x13e   : > { %s558_s25 = sshll.u32 %s549_s9, 4  ;;  %s2382_s28 = scalar_lea.hbm %s3093_s24, 256  ;;  %s3125_s25 = int_to_ptr.vmem [resolvable:$true] %s558_s25 }
 0x13f   : > { %p2383_p9 = scmp.ne.s32.totalorder %s3093_s24, %s2382_s28  ;;  %s2387_s29 = scalar_lea.hbm %s3467_s16, 2048 }
 0x140   : > { %p2388_p6 = scmp.lt.u32.totalorder %s3093_s24, %s3467_s16  ;;  %p2389_p8 = scmp.lt.u32.totalorder %s2387_s29, %s2382_s28 }
 0x141   : > { %p2385_p13 = pnand %p2383_p9, %p3451_p3 }
 0x142   : > { %p2390_p10 = por %p2389_p8, %p2388_p6 }
 0x143   : > { %1998 = dma.hbm_to_vmem [thread:$0]  (!%p3083_p2), %s3077_s18, 256, %s3087_s30, %s3468_s0, %s3442_s4, %s3442_s4, %s3441_s5  }
 0x144   : > { %p2386_p0 = pneg %p2385_p13  ;;  %p2391_p2 = scmp.lt.u32.totalorder %s2382_s28, %s3093_s24 }
 0x146   : > { %p2392_p4 = por %p2391_p2, %p2390_p10 }
 0x148   : > { %p2393_p1 = pnand %p2392_p4, %p2386_p0 }
 0x14a   : > { %2396 = shalt.err (!%p2393_p1)
}
 0x14b   : > { %s2397_s11 = scalar_lea.vmem %s3125_s25, 256  ;;  %s2603_s18 = smov [#allocation10]  }
 0x14c   : > { %p2398_p12 = scmp.ne.s32.totalorder %s3125_s25, %s2397_s11  ;;  %s2402_s30 = sshll.u32 %s2603_s18, 4  ;;  %s2403_s30 = int_to_ptr.vmem [resolvable:$false] %s2402_s30 }
 0x14d   : > { %s2404_s27 = scalar_lea.vmem %s2403_s30, 512  ;;  %p2405_p11 = scmp.lt.s32.totalorder %s3125_s25, %s2403_s30 }
 0x14e   : > { %p2400_p5 = pnand %p2398_p12, %p3451_p3  ;;  %p2406_p9 = scmp.lt.s32.totalorder %s2404_s27, %s2397_s11 }
 0x150   : > { %p2401_p7 = pneg %p2400_p5  ;;  %p2407_p13 = por %p2406_p9, %p2405_p11 }
 0x152   : > { %p2408_p6 = pnand %p2407_p13, %p2401_p7 }
 0x154   : > { %2411 = shalt.err (!%p2408_p6)
}
 0x155   : > { %p3469_p0 = scmp.ne.s32.totalorder %s3436_s12, 0  ;;  %s3470_s2 = sld [smem:[#allocation38_spill]] }
 0x157   : > { %2004 = dma.hbm_to_vmem [thread:$0]  (!%p3469_p0), %s3093_s24, 256, %s3125_s25, %s2912_s15, %s3442_s4, %s3442_s4, %s3441_s5  }
 0x15b   : > { %p3471_p3 = scmp.ne.s32.totalorder %s3470_s2, 0 }
 0x15c   : > { %s3472_s7 = sld [smem:[#allocation33_spill]] (!%p3471_p3)  ;;  %s3473_s0 = sld [smem:[#allocation41_spill]] (!%p3471_p3) }
 0x15d   : > { %570 = sbr.rel (%p3471_p3) target bundleno = 953 (0x3b9), region = 64 }
 0x162   : > { %s572_s9 = sand.u32 (!%p3471_p3), 1, %s3472_s7   ;;  %p3474_p8 = scmp.ne.s32.totalorder (!%p3471_p3), %s3473_s0, 0 }
 0x163   : > { %s3155_s28 = sshll.u32 (!%p3471_p3), %s572_s9, 4  ;;  %s573_s22 = scalar_lea.sflag (!%p3471_p3), [#allocation3], %s572_s9 }
 0x164   : > { %s576_s21 = scalar_lea.vmem [#allocation2], %s3155_s28 }
 0x165   : > { %2513 = dma.done.wait (%p3474_p8), %s573_s22, 256  }
 0x166   : > { %2515 = vsyncadd (%p3474_p8), %s573_s22, 4294967040  ;;  %s581_s12 = sand.u32 1, %s2730_s14   ;;  %s585_s5 = scalar_lea.vmem [#allocation5], %s3155_s28 }
 0x167   : > { %s582_s15 = scalar_lea.sflag [#allocation6], %s581_s12 }
 0x168   : > { %2517 = dma.done.wait (%p3474_p8), %s582_s15, 256  }
 0x169   : > { %2519 = vsyncadd (%p3474_p8), %s582_s15, 4294967040  ;;  %s3475_s4 = sld [smem:[#allocation32_spill]]  ;;  %p3476_p10 = scmp.ne.s32.totalorder %s3460_s3, 0 }
 0x16f   : > { %s3169_s24 = sand.u32 1, %s3475_s4  }
 0x170   : > { %s3172_s25 = sshll.u32 %s3169_s24, 4 }
 0x171   : > { %s594_s29 = scalar_lea.vmem [#allocation7], %s3172_s25 }
 0x172   : > { %2521 = dma.done.wait (%p3476_p10), %s582_s15, 256  }
 0x173   : > { %2523 = vsyncadd (%p3476_p10), %s582_s15, 4294967040  ;;  %s600_s6 = scalar_lea.sflag [#allocation9], %s581_s12  ;;  %s603_s20 = scalar_lea.vmem [#allocation8], %s3155_s28 }
 0x174   : > { %2525 = dma.done.wait (%p3474_p8), %s600_s6, 512  }
 0x175   : > { %2527 = vsyncadd (%p3474_p8), %s600_s6, 4294966784  ;;  %s612_s11 = scalar_lea.vmem [#allocation10], %s3155_s28  ;;  %p3477_p2 = scmp.eq.s32.totalorder %s2730_s14, 0 }
 0x177   : > { %2529 = dma.done.wait (%p3477_p2), [#allocation12], 512   ;;  %p3478_p4 = pmov %p3477_p2 }
 0x178   : > { %p3479_p1 = pmov %p3477_p2 }
 0x179   : > { %2531 = vsyncadd (%p3478_p4), [#allocation12], 4294966784 }
 0x17a   : > { %2533 = dma.done.wait (%p3479_p1), [#allocation15], 4096   ;;  %p3480_p12 = pmov %p3479_p1 }
 0x17b   : > { %p3481_p5 = pmov %p3479_p1 }
 0x17c   : > { %2535 = vsyncadd (%p3480_p12), [#allocation15], 4294963200 }
 0x17d   : > { %2537 = dma.done.wait (%p3481_p5), [#allocation18], 2048   ;;  %p3482_p7 = pmov %p3479_p1 }
 0x17e   : > { %s3198_s3 = scalar_lea.vmem [#allocation19], %s3172_s25  ;;  %s3201_s18 = scalar_lea.vmem [#allocation20], %s3172_s25 }
 0x17f   : > { %2539 = vsyncadd (%p3482_p7), [#allocation18], 4294965248  ;;  %s3483_s30 = sld [smem:[#allocation34_spill]] }
 0x185   : > { %p1621_p11 = scmp.ne.s32.totalorder %s3483_s30, 0 }
 0x186   : > { %v2604_v0 = vmov (!%p1621_p11), 0.0  }
 0x187   : > { %701 = sbr.rel (%p1621_p11) target bundleno = 398 (0x18e), region = 108  ;;  %702 = vst [vmem:[%s3198_s3] sm:$0xff] (!%p1621_p11), %v2604_v0  ;;  %703 = vst [vmem:[%s3198_s3 + $0x8] sm:$0xff] (!%p1621_p11), %v2604_v0 }
 0x188   : > { %704 = vst [vmem:[%s3201_s18] sm:$0xff] (!%p1621_p11), %v2604_v0  ;;  %705 = vst [vmem:[%s3201_s18 + $0x8] sm:$0xff] (!%p1621_p11), %v2604_v0 }
 0x18e PF: > { %v716_v1 = vld [vmem:[#allocation14] sm:$0xff]  ;;  %v717_v2 = vld [vmem:[#allocation14 + $0x8] sm:$0xff]  ;;  %v718_v6 = vld [vmem:[#allocation14 + $0x10] sm:$0xff]  ;;  %s3484_s2 = sld [smem:[#allocation49_spill]]  ;;  %vm999_vm0 = vcmask 130048   ;;  %s1302_s28 = sshll.u32 %s3198_s3, 4  ;;  %s3252_s28 = int_to_ptr.vmem [resolvable:$true] %s1302_s28 }
 0x18f   : > { %v807_v3 = vld [vmem:[#allocation16] sm:$0xff]  ;;  %v1831_v4 = vpack.c.bf16 %v717_v2, %v716_v1  ;;  %v808_v5 = vld [vmem:[#allocation16 + $0x8] sm:$0xff]  ;;  %v719_v7 = vld [vmem:[#allocation14 + $0x18] sm:$0xff]  ;;  %s3485_s9 = sld [smem:[#allocation35_spill]]  ;;  %s3486_s15 = sld [smem:[#allocation54_spill]] }
 0x190   : > { %v1863_v8 = vpack.c.bf16 %v808_v5, %v807_v3  ;;  %v1835_v9 = vpack.c.bf16 %v719_v7, %v718_v6  ;;  %v809_v10 = vld [vmem:[#allocation16 + $0x10] sm:$0xff]  ;;  %v810_v11 = vld [vmem:[#allocation16 + $0x18] sm:$0xff]  ;;  %v720_v12 = vld [vmem:[#allocation14 + $0x20] sm:$0xff]  ;;  %s1318_s4 = sshll.u32 %s3201_s18, 4  ;;  %s3487_s6 = sld [smem:[#allocation55_spill]]  ;;  %s3261_s4 = int_to_ptr.vmem [resolvable:$true] %s1318_s4 }
 0x191   : > { %1832 = vmatprep.subr.bf16.mxu0 %v1831_v4  ;;  %v1867_v13 = vpack.c.bf16 %v810_v11, %v809_v10  ;;  %v721_v14 = vld [vmem:[#allocation14 + $0x28] sm:$0xff]  ;;  %v811_v15 = vld [vmem:[#allocation16 + $0x20] sm:$0xff]  ;;  %v722_v19 = vld [vmem:[#allocation14 + $0x30] sm:$0xff]  ;;  %s2412_s30 = scalar_lea.vmem %s3252_s28, 256  ;;  %p3488_p13 = scmp.ne.s32.totalorder %s3461_s17, 0 }
 0x192   : > { %v812_v16 = vld [vmem:[#allocation16 + $0x28] sm:$0xff]  ;;  %1864 = vmatprep.subr.bf16.mxu1 %v1863_v8  ;;  %1834 = vmatpush3.bf16.msra.mxu0 %v1831_v4  ;;  %v1839_v17 = vpack.c.bf16 %v721_v14, %v720_v12  ;;  %v723_v20 = vld [vmem:[#allocation14 + $0x38] sm:$0xff]  ;;  %v813_v21 = vld [vmem:[#allocation16 + $0x30] sm:$0xff]  ;;  %p2413_p9 = scmp.ne.s32.totalorder %s3252_s28, %s2412_s30  ;;  %s2605_s14 = smov [#allocation19]  }
 0x193   : > { %1866 = vmatpush3.bf16.msra.mxu1 %v1863_v8  ;;  %1836 = vmatprep.subr.bf16.mxu0 %v1835_v9  ;;  %v1871_v18 = vpack.c.bf16 %v812_v16, %v811_v15  ;;  %v814_v22 = vld [vmem:[#allocation16 + $0x38] sm:$0xff]  ;;  %v1843_v23 = vpack.c.bf16 %v723_v20, %v722_v19  ;;  %v724_v24 = vld [vmem:[#allocation14 + $0x40] sm:$0xff]  ;;  %v725_v26 = vld [vmem:[#allocation14 + $0x48] sm:$0xff]  ;;  %s2416_s27 = sshll.u32 %s2605_s14, 4  ;;  %s2417_s27 = int_to_ptr.vmem [resolvable:$false] %s2416_s27 }
 0x194   : > { %1868 = vmatprep.subr.bf16.mxu1 %v1867_v13  ;;  %v1875_v25 = vpack.c.bf16 %v814_v22, %v813_v21  ;;  %v815_v27 = vld [vmem:[#allocation16 + $0x40] sm:$0xff]  ;;  %v816_v29 = vld [vmem:[#allocation16 + $0x48] sm:$0xff]  ;;  %v1847_v34 = vpack.c.bf16 %v725_v26, %v724_v24  ;;  %v726_v36 = vld [vmem:[#allocation14 + $0x50] sm:$0xff]  ;;  %p2414_p6 = pnand %p2413_p9, %p3488_p13  ;;  %s2418_s7 = scalar_lea.vmem %s2417_s27, 512 }
 0x195   : > { %v706_v28 = vld [vmem:[%s576_s21] sm:$0xff]  ;;  %v1879_v35 = vpack.c.bf16 %v816_v29, %v815_v27  ;;  %v727_v37 = vld [vmem:[#allocation14 + $0x58] sm:$0xff]  ;;  %v729_v43 = vld [vmem:[#allocation14 + $0x68] sm:$0xff]  ;;  %s1637_s22 = sshll.u32 %s3485_s9, 8  ;;  %p2419_p3 = scmp.lt.s32.totalorder %s3252_s28, %s2417_s27 }
 0x196   : > { %1838 = vmatpush3.bf16.msra.mxu0 %v1835_v9  ;;  %v710_v30 = vld [vmem:[%s594_s29] sm:$0xff]  ;;  %v818_v39 = vld [vmem:[#allocation16 + $0x58] sm:$0xff]  ;;  %v1851_v40 = vpack.c.bf16 %v727_v37, %v726_v36  ;;  %v820_v45 = vld [vmem:[#allocation16 + $0x68] sm:$0xff]  ;;  %p2415_p0 = pneg %p2414_p6  ;;  %p2420_p8 = scmp.lt.s32.totalorder %s2418_s7, %s2412_s30 }
 0x197   : > { %1870 = vmatpush3.bf16.msra.mxu1 %v1867_v13  ;;  %1840 = vmatprep.subr.bf16.mxu0 %v1839_v17  ;;  %v708_v31 = vld [vmem:[%s585_s5] sm:$0xff]  ;;  %v712_v32 = vmul.f32 %v710_v30, %v706_v28  ;;  %v731_v49 = vld [vmem:[#allocation14 + $0x78] sm:$0xff]  ;;  %v901_v55 = vld [vmem:[#allocation17 + $0x8] sm:$0xff] }
 0x198   : > { %1872 = vmatprep.subr.bf16.mxu1 %v1871_v18  ;;  %v714_v33 = vmul.f32 %v710_v30, %v708_v31  ;;  %v817_v38 = vld [vmem:[#allocation16 + $0x50] sm:$0xff]  ;;  %v728_v42 = vld [vmem:[#allocation14 + $0x60] sm:$0xff]  ;;  %v822_v51 = vld [vmem:[#allocation16 + $0x78] sm:$0xff]  ;;  %p2421_p10 = por %p2420_p8, %p2419_p3 }
 0x199   : > { %1737 = vmatprep.mubr.f32.mxu0 %v712_v32  ;;  %v1883_v41 = vpack.c.bf16 %v818_v39, %v817_v38  ;;  %v819_v44 = vld [vmem:[#allocation16 + $0x60] sm:$0xff]  ;;  %v1855_v46 = vpack.c.bf16 %v729_v43, %v728_v42  ;;  %v730_v48 = vld [vmem:[#allocation14 + $0x70] sm:$0xff]  ;;  %v707_v56 = vld [vmem:[%s576_s21 + $0x8] sm:$0xff] }
 0x19a   : > { %1842 = vmatpush3.bf16.msra.mxu0 %v1839_v17  ;;  %1772 = vmatprep.mubr.f32.mxu1 %v714_v33  ;;  %v1887_v47 = vpack.c.bf16 %v820_v45, %v819_v44  ;;  %v821_v50 = vld [vmem:[#allocation16 + $0x70] sm:$0xff]  ;;  %v1859_v52 = vpack.c.bf16 %v731_v49, %v730_v48  ;;  %v900_v54 = vld [vmem:[#allocation17] sm:$0xff]  ;;  %v711_v57 = vld [vmem:[%s594_s29 + $0x8] sm:$0xff]  ;;  %v898_v0 = vadd.f32 %v714_v33, %v712_v32  ;;  %p2422_p2 = pnand %p2421_p10, %p2415_p0 }
 0x19b   : > { %1874 = vmatpush3.bf16.msra.mxu1 %v1871_v18  ;;  %1844 = vmatprep.subr.bf16.mxu0 %v1843_v23  ;;  %v1891_v53 = vpack.c.bf16 %v822_v51, %v821_v50  ;;  %v709_v58 = vld [vmem:[%s585_s5 + $0x8] sm:$0xff]  ;;  %v1895_v59 = vpack.c.bf16 %v901_v55, %v900_v54  ;;  %v902_v60 = vld [vmem:[#allocation17 + $0x10] sm:$0xff]  ;;  %v713_v62 = vmul.f32 %v711_v57, %v707_v56  ;;  %v904_v2 = vld [vmem:[#allocation17 + $0x20] sm:$0xff]  ;;  %s3249_s5 = scalar_lea.hbm %s3486_s15, %s1637_s22 }
 0x19c   : > { %1876 = vmatprep.subr.bf16.mxu1 %v1875_v25  ;;  %v903_v61 = vld [vmem:[#allocation17 + $0x18] sm:$0xff]  ;;  %v715_v63 = vmul.f32 %v711_v57, %v709_v58  ;;  %v905_v3 = vld [vmem:[#allocation17 + $0x28] sm:$0xff]  ;;  %v906_v5 = vld [vmem:[#allocation17 + $0x30] sm:$0xff] }
 0x19d   : > { %v1899_v1 = vpack.c.bf16 %v903_v61, %v902_v60  ;;  %v1903_v4 = vpack.c.bf16 %v905_v3, %v904_v2  ;;  %v907_v6 = vld [vmem:[#allocation17 + $0x38] sm:$0xff]  ;;  %v908_v8 = vld [vmem:[#allocation17 + $0x40] sm:$0xff]  ;;  %v909_v9 = vld [vmem:[#allocation17 + $0x48] sm:$0xff] }
 0x19e   : > { %1846 = vmatpush3.bf16.msra.mxu0 %v1843_v23  ;;  %v1907_v7 = vpack.c.bf16 %v907_v6, %v906_v5  ;;  %v1911_v10 = vpack.c.bf16 %v909_v9, %v908_v8  ;;  %v910_v11 = vld [vmem:[#allocation17 + $0x50] sm:$0xff]  ;;  %v911_v12 = vld [vmem:[#allocation17 + $0x58] sm:$0xff]  ;;  %v912_v14 = vld [vmem:[#allocation17 + $0x60] sm:$0xff]  ;;  %v899_v20 = vadd.f32 %v715_v63, %v713_v62 }
 0x19f   : > { %1878 = vmatpush3.bf16.msra.mxu1 %v1875_v25  ;;  %1848 = vmatprep.subr.bf16.mxu0 %v1847_v34  ;;  %v1915_v13 = vpack.c.bf16 %v911_v12, %v910_v11  ;;  %v913_v15 = vld [vmem:[#allocation17 + $0x68] sm:$0xff]  ;;  %v914_v17 = vld [vmem:[#allocation17 + $0x70] sm:$0xff]  ;;  %v915_v18 = vld [vmem:[#allocation17 + $0x78] sm:$0xff] }
 0x1a0   : > { %1880 = vmatprep.subr.bf16.mxu1 %v1879_v35  ;;  %v1919_v16 = vpack.c.bf16 %v913_v15, %v912_v14  ;;  %v1923_v19 = vpack.c.bf16 %v915_v18, %v914_v17  ;;  %v997_v21 = vld [vmem:[%s3484_s2] sm:$0xff]  ;;  %v998_v29 = vld [vmem:[%s3484_s2 + $0x8] sm:$0xff]  ;;  %v1164_v42 = vld [vmem:[#allocation13] sm:$0xff] }
 0x1a1   : > { %v1081_v30 = vld [vmem:[#allocation11] sm:$0xff]  ;;  %v1165_v43 = vld [vmem:[#allocation13 + $0x8] sm:$0xff] }
 0x1a2   : > { %1850 = vmatpush3.bf16.msra.mxu0 %v1847_v34  ;;  %v1258_v54 = vld [vmem:[%s612_s11 + $0x8] sm:$0xff]  ;;  %v1255_v56 = vld [vmem:[%s603_s20] sm:$0xff] }
 0x1a3   : > { %1882 = vmatpush3.bf16.msra.mxu1 %v1879_v35  ;;  %1852 = vmatprep.subr.bf16.mxu0 %v1851_v40  ;;  %v1257_v57 = vld [vmem:[%s612_s11] sm:$0xff]  ;;  %v1260_v2 = vld [vmem:[%s3198_s3 + $0x8] sm:$0xff]  ;;  %s1284_s11 = scalar_lea.sflag [#allocation4], %s3169_s24 }
 0x1a4   : > { %1884 = vmatprep.subr.bf16.mxu1 %v1883_v41  ;;  %v1272_v3 = vld [vmem:[%s3201_s18 + $0x8] sm:$0xff]  ;;  %v1259_v8 = vld [vmem:[%s3198_s3] sm:$0xff] }
 0x1a5   : > { %v1271_v9 = vld [vmem:[%s3201_s18] sm:$0xff] }
 0x1a6   : > { %1854 = vmatpush3.bf16.msra.mxu0 %v1851_v40 }
 0x1a7   : > { %1886 = vmatpush3.bf16.msra.mxu1 %v1883_v41  ;;  %1856 = vmatprep.subr.bf16.mxu0 %v1855_v46  ;;  %v1082_v41 = vld [vmem:[#allocation11 + $0x8] sm:$0xff] }
 0x1a8   : > { %1888 = vmatprep.subr.bf16.mxu1 %v1887_v47 }
 0x1aa   : > { %1858 = vmatpush3.bf16.msra.mxu0 %v1855_v46 }
 0x1ab   : > { %1890 = vmatpush3.bf16.msra.mxu1 %v1887_v47  ;;  %1860 = vmatprep.subr.bf16.mxu0 %v1859_v52 }
 0x1ac   : > { %1892 = vmatprep.subr.bf16.mxu1 %v1891_v53 }
 0x1ae   : > { %1862 = vmatpush3.bf16.msra.mxu0 %v1859_v52 }
 0x1af   : > { %1894 = vmatpush3.bf16.msra.mxu1 %v1891_v53  ;;  %1896 = vmatprep.subr.bf16.mxu0 %v1895_v59  ;;  %v1256_v53 = vld [vmem:[%s603_s20 + $0x8] sm:$0xff]  ;;  %s3259_s20 = scalar_lea.hbm %s3487_s6, %s1637_s22 }
 0x1b1   : > { %1738 = vmatmul.mubr.f32.vlgmr.msra.gmra.mrb[0].mxu0 %v713_v62 }
 0x1b2   : > { %1773 = vmatmul.mubr.f32.vlgmr.msra.gmra.mrb[0].mxu1 %v715_v63  ;;  %1898 = vmatpush3.bf16.msra.mxu0 %v1895_v59 }
 0x1b3   : > { %1900 = vmatprep.subr.bf16.mxu0 %v1899_v1  ;;  %1807 = vmatprep.mubr.f32.mxu0 %v898_v0 }
 0x1b4   : > { %1814 = vmatprep.mubr.msk.f32.mxu1 %vm999_vm0, %v997_v21 }
 0x1b6   : > { %1902 = vmatpush3.bf16.msra.mxu0 %v1899_v1 }
 0x1b7   : > { %1904 = vmatprep.subr.bf16.mxu0 %v1903_v4 }
 0x1ba   : > { %1906 = vmatpush3.bf16.msra.mxu0 %v1903_v4 }
 0x1bb   : > { %1908 = vmatprep.subr.bf16.mxu0 %v1907_v7 }
 0x1be   : > { %1910 = vmatpush3.bf16.msra.mxu0 %v1907_v7 }
 0x1bf   : > { %1912 = vmatprep.subr.bf16.mxu0 %v1911_v10 }
 0x1c2   : > { %1914 = vmatpush3.bf16.msra.mxu0 %v1911_v10 }
 0x1c3   : > { %1916 = vmatprep.subr.bf16.mxu0 %v1915_v13 }
 0x1c6   : > { %1918 = vmatpush3.bf16.msra.mxu0 %v1915_v13 }
 0x1c7   : > { %1920 = vmatprep.subr.bf16.mxu0 %v1919_v16 }
 0x1ca   : > { %1922 = vmatpush3.bf16.msra.mxu0 %v1919_v16 }
 0x1cb   : > { %1924 = vmatprep.subr.bf16.mxu0 %v1923_v19 }
 0x1ce   : > { %1926 = vmatpush3.bf16.msra.mxu0 %v1923_v19 }
 0x1d1   : > { %1808 = vmatmul.mubr.f32.vlgmr.msra.gmra.mrb[2].mxu0 %v899_v20 }
 0x284   : > { %v1739_v22 = vpop.f32.mrb[0].mxu0 }
 0x285   : > { %v1774_v23 = vpop.f32.mrb[0].mxu1  ;;  %v798_v24 = vpop.f32.mrb[1].mxu0 }
 0x286   : > { %v992_v25 = vsub.f32 %v1739_v22, %v1774_v23  ;;  %v889_v26 = vpop.f32.mrb[1].mxu1 }
 0x287   : > { %v991_v27 = vsub.f32 %v798_v24, %v889_v26 }
 0x289   : > { %v1927_v28 = vpack.c.bf16 %v992_v25, %v991_v27 }
 0x28b   : > { %1928 = vmatprep.subr.bf16.mxu1 %v1927_v28 }
 0x28c   : > { %1930 = vmatpush3.bf16.msra.mxu1 %v1927_v28 }
 0x28f   : > { %1815 = vmatmul.mubr.msk.f32.vlgmr.msra.gmra.mrb[2].mxu1 %vm999_vm0, %v998_v29 }
 0x290   : > { %1821 = vmatprep.mubr.msk.f32.mxu1 %vm999_vm0, %v1081_v30 }
 0x2a4   : > { %v1809_v31 = vpop.f32.mrb[2].mxu0 }
 0x2a5   : > { %v994_v32 = vsub.f32 %v1809_v31, %v1739_v22  ;;  %v982_v33 = vpop.f32.mrb[3].mxu0 }
 0x2a6   : > { %v993_v34 = vsub.f32 %v982_v33, %v798_v24 }
 0x2a7   : > { %v996_v35 = vsub.f32 %v994_v32, %v1774_v23 }
 0x2a8   : > { %v995_v36 = vsub.f32 %v993_v34, %v889_v26 }
 0x2a9   : > { %v1167_v37 = vadd.f32 %v996_v35, %v992_v25 }
 0x2aa   : > { %v1166_v38 = vadd.f32 %v995_v36, %v991_v27  ;;  %v1931_v39 = vpack.c.bf16 %v996_v35, %v995_v36 }
 0x2ac   : > { %1932 = vmatprep.subr.bf16.mxu1 %v1931_v39  ;;  %v1935_v40 = vpack.c.bf16 %v1167_v37, %v1166_v38 }
 0x2ad   : > { %1934 = vmatpush3.bf16.msra.mxu1 %v1931_v39 }
 0x2ae   : > { %1936 = vmatprep.subr.bf16.mxu1 %v1935_v40 }
 0x2b0   : > { %1822 = vmatmul.mubr.msk.f32.vlgmr.msra.gmra.mrb[4].mxu1 %vm999_vm0, %v1082_v41 }
 0x2b1   : > { %1938 = vmatpush3.bf16.msra.mxu1 %v1935_v40  ;;  %1828 = vmatprep.mubr.msk.f32.mxu1 %vm999_vm0, %v1164_v42 }
 0x2b4   : > { %1829 = vmatmul.mubr.msk.f32.vlgmr.msra.gmra.mrb[6].mxu1 %vm999_vm0, %v1165_v43 }
 0x362   : > { %v1816_v44 = vpop.f32.mrb[2].mxu1 }
 0x363   : > { %v1072_v45 = vpop.f32.mrb[3].mxu1 }
 0x383   : > { %v1823_v46 = vpop.f32.mrb[4].mxu1 }
 0x384   : > { %v1250_v47 = vsub.f32 %v1816_v44, %v1823_v46  ;;  %v1155_v48 = vpop.f32.mrb[5].mxu1 }
 0x385   : > { %v1249_v49 = vsub.f32 %v1072_v45, %v1155_v48 }
 0x386   : > { %v1262_v60 = vmul.f32 %v1256_v53, %v1250_v47  ;;  %v1276_v61 = vmul.f32 %v1258_v54, %v1250_v47 }
 0x387   : > { %v1830_v50 = vpop.f32.mrb[6].mxu1  ;;  %v1261_v0 = vmul.f32 %v1255_v56, %v1249_v49  ;;  %v1275_v1 = vmul.f32 %v1257_v57, %v1249_v49 }
 0x388   : > { %v1252_v51 = vsub.f32 %v1830_v50, %v1816_v44  ;;  %v1240_v52 = vpop.f32.mrb[7].mxu1 }
 0x389   : > { %v1251_v55 = vsub.f32 %v1240_v52, %v1072_v45 }
 0x38a   : > { %v1254_v58 = vsub.f32 %v1252_v51, %v1823_v46 }
 0x38b   : > { %v1253_v59 = vsub.f32 %v1251_v55, %v1155_v48 }
 0x38c   : > { %v1264_v62 = vmul.f32 %v1258_v54, %v1254_v58  ;;  %v1274_v63 = vmul.f32 %v1256_v53, %v1254_v58 }
 0x38d   : > { %v1263_v4 = vmul.f32 %v1257_v57, %v1253_v59  ;;  %v1273_v5 = vmul.f32 %v1255_v56, %v1253_v59 }
 0x38e   : > { %v1266_v6 = vadd.f32 %v1264_v62, %v1262_v60  ;;  %v1278_v7 = vsub.f32 %v1274_v63, %v1276_v61 }
 0x38f   : > { %v1265_v10 = vadd.f32 %v1263_v4, %v1261_v0  ;;  %v1277_v11 = vsub.f32 %v1273_v5, %v1275_v1 }
 0x390   : > { %v1268_v12 = vadd.f32 %v1266_v6, %v1260_v2  ;;  %v1280_v13 = vadd.f32 %v1278_v7, %v1272_v3 }
 0x391   : > { %v1267_v14 = vadd.f32 %v1265_v10, %v1259_v8  ;;  %v1279_v15 = vadd.f32 %v1277_v11, %v1271_v9 }
 0x392   : > { %1270 = vst [vmem:[%s3198_s3 + $0x8] sm:$0xff] %v1268_v12  ;;  %1282 = vst [vmem:[%s3201_s18 + $0x8] sm:$0xff] %v1280_v13 }
 0x393   : > { %1269 = vst [vmem:[%s3198_s3] sm:$0xff] %v1267_v14  ;;  %1281 = vst [vmem:[%s3201_s18] sm:$0xff] %v1279_v15 }
 0x394   : > { %2425 = shalt.err (!%p2422_p2)
}
 0x395   : > { %s2426_s3 = scalar_lea.hbm %s3249_s5, 256  ;;  %s2430_s9 = scalar_lea.hbm %s3486_s15, 512 }
 0x396   : > { %p2427_p4 = scmp.ne.s32.totalorder %s3249_s5, %s2426_s3  ;;  %p2431_p5 = scmp.lt.u32.totalorder %s3249_s5, %s3486_s15 }
 0x397   : > { %p2432_p7 = scmp.lt.u32.totalorder %s2430_s9, %s2426_s3  ;;  %p2434_p9 = scmp.lt.u32.totalorder %s2426_s3, %s3249_s5 }
 0x398   : > { %p2428_p1 = pnand %p2427_p4, %p3488_p13 }
 0x399   : > { %p2433_p11 = por %p2432_p7, %p2431_p5 }
 0x39a   : > { %p2429_p12 = pneg %p2428_p1 }
 0x39b   : > { %p2435_p6 = por %p2434_p9, %p2433_p11 }
 0x39d   : > { %p2436_p0 = pnand %p2435_p6, %p2429_p12 }
 0x39f   : > { %2439 = shalt.err (!%p2436_p0)
}
 0x3a0   : > { %s2606_s12 = smov 128   ;;  %s2607_s25 = smov 8  }
 0x3a1   : > { %1969 = dma.vmem_to_hbm [thread:$0]  (%p3488_p13), %s3252_s28, 256, %s3249_s5, %s1284_s11, %s2606_s12, %s2606_s12, %s2607_s25  }
 0x3a2   : > { %s1289_s29 = scalar_lea.sflag [#allocation21], %s3169_s24  ;;  %s2440_s30 = scalar_lea.vmem %s3261_s4, 256 }
 0x3a3   : > { %p2441_p3 = scmp.ne.s32.totalorder %s3261_s4, %s2440_s30  ;;  %s2608_s14 = smov [#allocation20]  }
 0x3a4   : > { %s2444_s27 = sshll.u32 %s2608_s14, 4  ;;  %s2445_s27 = int_to_ptr.vmem [resolvable:$false] %s2444_s27 }
 0x3a5   : > { %p2442_p8 = pnand %p2441_p3, %p3488_p13  ;;  %s2446_s7 = scalar_lea.vmem %s2445_s27, 512 }
 0x3a6   : > { %p2447_p2 = scmp.lt.s32.totalorder %s3261_s4, %s2445_s27  ;;  %p2448_p4 = scmp.lt.s32.totalorder %s2446_s7, %s2440_s30 }
 0x3a7   : > { %p2443_p10 = pneg %p2442_p8 }
 0x3a8   : > { %p2449_p1 = por %p2448_p4, %p2447_p2 }
 0x3aa   : > { %p2450_p12 = pnand %p2449_p1, %p2443_p10 }
 0x3ac   : > { %2453 = shalt.err (!%p2450_p12)
}
 0x3ad   : > { %s2454_s28 = scalar_lea.hbm %s3259_s20, 256  ;;  %s2458_s3 = scalar_lea.hbm %s3487_s6, 512 }
 0x3ae   : > { %p2455_p5 = scmp.ne.s32.totalorder %s3259_s20, %s2454_s28  ;;  %p2459_p9 = scmp.lt.u32.totalorder %s3259_s20, %s3487_s6 }
 0x3af   : > { %p2460_p6 = scmp.lt.u32.totalorder %s2458_s3, %s2454_s28  ;;  %p2462_p3 = scmp.lt.u32.totalorder %s2454_s28, %s3259_s20 }
 0x3b0   : > { %p2456_p7 = pnand %p2455_p5, %p3488_p13 }
 0x3b1   : > { %p2461_p0 = por %p2460_p6, %p2459_p9 }
 0x3b2   : > { %p2457_p11 = pneg %p2456_p7 }
 0x3b3   : > { %p2463_p8 = por %p2462_p3, %p2461_p0 }
 0x3b5   : > { %p2464_p10 = pnand %p2463_p8, %p2457_p11 }
 0x3b7   : > { %2467 = shalt.err (!%p2464_p10)
}
 0x3b8   : > { %1970 = dma.vmem_to_hbm [thread:$0]  (%p3488_p13), %s3261_s4, 256, %s3259_s20, %s1289_s29, %s2606_s12, %s2606_s12, %s2607_s25  }
 0x3b9 PF: > { %s3489_s9 = sld [smem:[#allocation31_spill]]  ;;  %p2023_p2 = scmp.ge.s32.totalorder %s2590_s13, 2 }
 0x3ba   : > { %p3490_p4 = scmp.ne.s32.totalorder %s3462_s19, 0 }
 0x3bc   : > { %p2006_p1 = pnand %p2023_p2, %p3490_p4 }
 0x3bf   : > { %s1333_s22 = sand.u32 1, %s3489_s9  }
 0x3c0   : > { %s1334_s21 = scalar_lea.sflag [#allocation4], %s1333_s22 }
 0x3c1   : > { %2541 = dma.done.wait (!%p2006_p1), %s1334_s21, 256  }
 0x3c2   : > { %2543 = vsyncadd (!%p2006_p1), %s1334_s21, 4294967040  ;;  %s1343_s17 = scalar_lea.sflag [#allocation21], %s1333_s22 }
 0x3c3   : > { %2545 = dma.done.wait (!%p2006_p1), %s1343_s17, 256  }
 0x3c4   : > { %2547 = vsyncadd (!%p2006_p1), %s1343_s17, 4294967040  ;;  %s41_s13 = sadd.s32 1, %s2590_s13   ;;  %s3491_s21 = sld [smem:[#allocation32_spill]] }
 0x3c5   : > { %p38_p12 = scmp.ge.s32.totalorder %s41_s13, 10   ;;  %s3492_s24 = sld [smem:[#allocation33_spill]] }
 0x3c6   : > { %s3493_s4 = sld [smem:[#allocation42_spill]]  ;;  %s3494_s27 = sld [smem:[#allocation36_spill]] }
 0x3c7   : > { %s3495_s28 = sld [smem:[#allocation37_spill]]  ;;  %s3496_s29 = sld [smem:[#allocation39_spill]] }
 0x3c8   : > { %s3497_s30 = sld [smem:[#allocation40_spill]]  ;;  %s3498_s22 = smov %s2558_s23 }
 0x3c9   : > { %s3499_s23 = smov %s3047_s1  ;;  %s3500_s25 = smov %s2570_s26 }
 0x3ca   :  { %40 = sbr.rel (!%p38_p12) target bundleno = 31 (0x1f), region = 198 }
 0x3cc   : > { %s3501_s26 = smov %s3493_s4 }
 0x3d1   :  { %1348 = vsyncpa [#allocation3], 1 }
 0x3d2   :  { %1350 = vsyncpa [#allocation3 + $0x1], 1 }
 0x3d3   :  { %1351 = vsyncpa [#allocation6], 1 }
 0x3d4   :  { %1353 = vsyncpa [#allocation6 + $0x1], 1 }
 0x3d5   :  { %1354 = vsyncpa [#allocation9], 1 }
 0x3d6   :  { %1356 = vsyncpa [#allocation9 + $0x1], 1 }
 0x3d7   :  { %1357 = vsyncpa [#allocation12], 1 }
 0x3d8   :  { %1358 = vsyncpa [#allocation15], 1 }
 0x3d9   :  { %1359 = vsyncpa [#allocation18], 1 }
 0x3da   :  { %1360 = vsyncpa [#allocation4], 1 }
 0x3db   :  { %1362 = vsyncpa [#allocation4 + $0x1], 1 }
 0x3dc   :  { %1363 = vsyncpa [#allocation21], 1 }
 0x3dd   :  { %1365 = vsyncpa [#allocation21 + $0x1], 1 }

</bundles_post_ra>
